<compile_context>
chip_gen: v7x
topology: tpu7x:2x2x1
jax: 0.10.0
libtpu: 0.0.40
codegen_flags: <defaults>
</compile_context>

<pallas_src>
import jax
import jax.numpy as jnp
from jax.experimental import pallas as pl
from jax.experimental.pallas import tpu as pltpu

ATT_DIM = 256                       # matches nn.Parameter(torch.randn(256, 256))
SCALE = ATT_DIM ** (-0.5)


def _attention_kernel(x_ref, w_ref, vs_ref, o_ref, xt_ref):
    # x_ref : (bt, C, T) f32   -- native NCT block
    # w_ref : (C, D)     bf16  -- W, pre-cast once in the wrapper
    # vs_ref: (1, D)     f32   -- (V * scale)^T
    # o_ref : (bt, C)    f32
    # xt_ref: (bt*T, C)  f32   -- VMEM scratch for the transposed block
    bt, C, T = x_ref.shape
    D = w_ref.shape[1]

    # 1) per-batch (C, T) -> (T, C) transpose into a flattened VMEM scratch.
    #    (XLU work only; short live ranges, static unroll with small bt.)
    for b in range(bt):
        xt_ref[b * T:(b + 1) * T, :] = jnp.transpose(x_ref[b], (1, 0))

    # 2) one flattened bf16 MXU matmul (M = bt*T, K = C, N = D), f32 accum.
    e = jnp.tanh(
        jnp.dot(xt_ref[...].astype(jnp.bfloat16), w_ref[...],
                preferred_element_type=jnp.float32))       # (bt*T, D) f32

    # 3) scores against (V*scale): lane reduce over D keeps the result directly
    #    in (sublane=batch, lane=T) layout; an MXU matvec would give (bt*T, 1)
    #    and force a sublane->lane relayout.
    s = jnp.sum(e.reshape(bt, T, D) * vs_ref[...], axis=-1)      # (bt, T)

    # 4) softmax over T (max-subtracted; identical semantics, overflow-safe).
    m = jnp.max(s, axis=-1, keepdims=True)                       # (bt, 1)
    p = jnp.exp(s - m)                                           # (bt, T)
    inv = pl.reciprocal(jnp.sum(p, axis=-1, keepdims=True), approx=True)
    alpha = p * inv                                              # (bt, T)

    # 5) weighted sum over T in the native C-major layout (VPU mul + lane
    #    reduce) using full-precision x; sublane-dense (bt, C) output store.
    o_ref[...] = jnp.sum(x_ref[...] * alpha[:, None, :], axis=-1)


def _round_up(v, m):
    return (v + m - 1) // m * m


def _pick_block_batch(B, C, T, budget_bytes=24 << 20, max_bt=32):
    """Largest bt <= max_bt dividing B whose per-step VMEM footprint fits.

    Accounts for (8, 128) tile padding (T << 128 pads the lane dim of the x
    block) and for the double-buffered input pipeline.
    """
    c_sub = _round_up(C, 8)
    t_lane = _round_up(T, 128)

    def vmem_bytes(bt):
        x_blk = 2 * bt * c_sub * t_lane * 4                     # double-buffered x
        xt = _round_up(bt * T, 8) * _round_up(C, 128) * 4       # transpose scratch
        act = _round_up(bt * T, 8) * _round_up(ATT_DIM, 128) * 4  # e activations
        return x_blk + xt + act

    best = 1
    for bt in range(1, min(B, max_bt) + 1):
        if B % bt == 0 and vmem_bytes(bt) <= budget_bytes:
            best = bt
    return best


def attention_forward(x_nct, W, V):
    """x_nct: (B, C=256, T) float32.  Returns (B, 256) float32."""
    B, C, T = x_nct.shape
    D = W.shape[1]
    assert W.shape == (C, D) and V.shape == (D, 1)

    bt = _pick_block_batch(B, C, T)
    w_bf16 = W.astype(jnp.bfloat16)                        # one-time 128 KiB cast
    vs = (V * SCALE).reshape(1, D).astype(jnp.float32)     # fold scale into V

    return pl.pallas_call(
        _attention_kernel,
        out_shape=jax.ShapeDtypeStruct((B, C), jnp.float32),
        grid_spec=pltpu.PrefetchScalarGridSpec(
            num_scalar_prefetch=0,
            grid=(B // bt,),
            in_specs=[
                pl.BlockSpec((bt, C, T), lambda i: (i, 0, 0)),    # x (native NCT)
                pl.BlockSpec((C, D), lambda i: (0, 0)),           # W (bf16)
                pl.BlockSpec((1, D), lambda i: (0, 0)),           # V * scale
            ],
            out_specs=pl.BlockSpec((bt, C), lambda i: (i, 0)),
            scratch_shapes=[pltpu.VMEM((bt * T, C), jnp.float32)],
        ),
        compiler_params=pltpu.CompilerParams(
            dimension_semantics=("parallel",),
            vmem_limit_bytes=48 * 1024 * 1024,
        ),
    )(x_nct, w_bf16, vs)
    # TODO(synk): for very large T, add a T grid axis ("arbitrary", last) with an
    # online-softmax accumulator so the per-step block stays within v7x's 64 MiB
    # VMEM; the current version keeps the full (bt, C, T) slab resident per step.


def _reference(x_nct, W, V, matmul_dtype=jnp.float32):
    """Direct transcription of the PyTorch forward (matmul precision knob)."""
    x = jnp.transpose(x_nct, (0, 2, 1)).astype(jnp.float32)      # (B, T, C)
    e = jnp.tanh(
        jnp.einsum("btc,cd->btd",
                   x.astype(matmul_dtype), W.astype(matmul_dtype),
                   preferred_element_type=jnp.float32))
    s = jnp.einsum("btd,do->bto", e, V.astype(jnp.float32))[..., 0] * SCALE
    n1 = jnp.exp(s)
    n2 = jnp.sum(n1, axis=1, keepdims=True)
    alpha = n1 / n2                                              # (B, T)
    return jnp.sum(alpha[:, :, None] * x, axis=1)                # (B, C)


if __name__ == "__main__":
    key = jax.random.PRNGKey(0)
    k_x, k_w, k_v = jax.random.split(key, 3)

    B, C, T = 2, 256, 8
    x = jax.random.normal(k_x, (B, C, T), dtype=jnp.float32)
    W = jax.random.normal(k_w, (C, ATT_DIM), dtype=jnp.float32)
    V = jax.random.normal(k_v, (ATT_DIM, 1), dtype=jnp.float32)

    out = jax.block_until_ready(attention_forward(x, W, V))
    assert out.shape == (B, C)

    # Primary check: precision-matched reference (bf16 matmul operands, f32 accum).
    ref_bf16 = _reference(x, W, V, matmul_dtype=jnp.bfloat16)
    assert jnp.allclose(out, ref_bf16, atol=2e-2, rtol=2e-2), "mismatch (bf16-matched ref)"
    # Loose sanity check against the original full-f32 module semantics.
    ref_f32 = _reference(x, W, V, matmul_dtype=jnp.float32)
    assert jnp.allclose(out, ref_f32, atol=5e-1, rtol=1e-1), "mismatch (f32 sanity ref)"

    print("KERNEL_OK")
</pallas_src>

<mosaic_0001>
module attributes {stable_mosaic.version = 11 : i64} {
  func.func @_attention_kernel(%arg0: i32, %arg1: memref<2x256x8xf32, #tpu.memory_space<vmem>>, %arg2: memref<256x256xbf16, #tpu.memory_space<vmem>>, %arg3: memref<1x256xf32, #tpu.memory_space<vmem>>, %arg4: memref<2x256xf32, #tpu.memory_space<vmem>>, %arg5: memref<16x256xf32, #tpu.memory_space<vmem>>) attributes {dimension_semantics = [#tpu.dimension_semantics<parallel>], iteration_bounds = array<i64: 1>, scalar_prefetch = 0 : i64, scratch_operands = 1 : i64, tpu.core_type = #tpu.core_type<tc>, window_params = [{transform_indices = @transform_0, window_bounds = array<i64: 2, 256, 8>}, {pipeline_mode = #tpu.pipeline_mode<synchronous>, transform_indices = @transform_1, window_bounds = array<i64: 256, 256>}, {pipeline_mode = #tpu.pipeline_mode<synchronous>, transform_indices = @transform_2, window_bounds = array<i64: 1, 256>}, {transform_indices = @transform_3, window_bounds = array<i64: 2, 256>}]} {
    %c0 = arith.constant 0 : index
    %c0_0 = arith.constant 0 : index
    %c0_1 = arith.constant 0 : index
    %0 = vector.load %arg1[%c0, %c0_0, %c0_1] : memref<2x256x8xf32, #tpu.memory_space<vmem>>, vector<1x256x8xf32>
    %1 = vector.shape_cast %0 : vector<1x256x8xf32> to vector<256x8xf32>
    %2 = tpu.transpose %1, [1, 0] : vector<256x8xf32> -> vector<8x256xf32>
    %c0_2 = arith.constant 0 : index
    %c0_3 = arith.constant 0 : index
    %3 = vector.load %arg5[%c0_2, %c0_3] : memref<16x256xf32, #tpu.memory_space<vmem>>, vector<8x256xf32>
    tpu.vector_store %arg5[%c0_2, %c0_3], %2 {strides = array<i32>} : memref<16x256xf32, #tpu.memory_space<vmem>>, vector<8x256xf32>,
    %c1 = arith.constant 1 : index
    %c0_4 = arith.constant 0 : index
    %c0_5 = arith.constant 0 : index
    %4 = vector.load %arg1[%c1, %c0_4, %c0_5] : memref<2x256x8xf32, #tpu.memory_space<vmem>>, vector<1x256x8xf32>
    %5 = vector.shape_cast %4 : vector<1x256x8xf32> to vector<256x8xf32>
    %6 = tpu.transpose %5, [1, 0] : vector<256x8xf32> -> vector<8x256xf32>
    %c8 = arith.constant 8 : index
    %c0_6 = arith.constant 0 : index
    %7 = vector.load %arg5[%c8, %c0_6] : memref<16x256xf32, #tpu.memory_space<vmem>>, vector<8x256xf32>
    tpu.vector_store %arg5[%c8, %c0_6], %6 {strides = array<i32>} : memref<16x256xf32, #tpu.memory_space<vmem>>, vector<8x256xf32>,
    %c0_7 = arith.constant 0 : index
    %c0_8 = arith.constant 0 : index
    %8 = vector.load %arg5[%c0_7, %c0_8] : memref<16x256xf32, #tpu.memory_space<vmem>>, vector<16x256xf32>
    %9 = arith.truncf %8 : vector<16x256xf32> to vector<16x256xbf16>
    %c0_9 = arith.constant 0 : index
    %c0_10 = arith.constant 0 : index
    %10 = vector.load %arg2[%c0_9, %c0_10] : memref<256x256xbf16, #tpu.memory_space<vmem>>, vector<256x256xbf16>
    %cst = arith.constant dense<0.000000e+00> : vector<16x256xf32>
    %11 = tpu.matmul %9, %10, %cst {dimension_numbers = #tpu.dot_dimension_numbers<[1], [0], [0], [1], [0, 0, 1, 1], [], []>} : vector<16x256xbf16>, vector<256x256xbf16>, vector<16x256xf32> -> vector<16x256xf32>
    %12 = math.tanh %11 : vector<16x256xf32>
    %13 = vector.shape_cast %12 : vector<16x256xf32> to vector<2x8x256xf32>
    %c0_11 = arith.constant 0 : index
    %c0_12 = arith.constant 0 : index
    %14 = vector.load %arg3[%c0_11, %c0_12] : memref<1x256xf32, #tpu.memory_space<vmem>>, vector<1x256xf32>
    %15 = vector.shape_cast %14 : vector<1x256xf32> to vector<1x1x256xf32>
    %16 = vector.broadcast %15 : vector<1x1x256xf32> to vector<2x8x256xf32>
    %17 = arith.mulf %13, %16 : vector<2x8x256xf32>
    %cst_13 = arith.constant dense<0.000000e+00> : vector<2x8xf32>
    %18 = vector.multi_reduction <add>, %17, %cst_13 [2] : vector<2x8x256xf32> to vector<2x8xf32>
    %cst_14 = arith.constant dense<0xFF800000> : vector<2xf32>
    %19 = vector.multi_reduction <maximumf>, %18, %cst_14 [1] : vector<2x8xf32> to vector<2xf32>
    %20 = vector.shape_cast %19 : vector<2xf32> to vector<2x1xf32>
    %21 = vector.broadcast %20 : vector<2x1xf32> to vector<2x8xf32>
    %22 = arith.subf %18, %21 : vector<2x8xf32>
    %23 = math.exp %22 : vector<2x8xf32>
    %cst_15 = arith.constant dense<0.000000e+00> : vector<2xf32>
    %24 = vector.multi_reduction <add>, %23, %cst_15 [1] : vector<2x8xf32> to vector<2xf32>
    %25 = vector.shape_cast %24 : vector<2xf32> to vector<2x1xf32>
    %26 = tpu.reciprocal %25 {approx = true} : vector<2x1xf32> -> vector<2x1xf32>
    %27 = vector.broadcast %26 : vector<2x1xf32> to vector<2x8xf32>
    %28 = arith.mulf %23, %27 : vector<2x8xf32>
    %c0_16 = arith.constant 0 : index
    %c0_17 = arith.constant 0 : index
    %c0_18 = arith.constant 0 : index
    %29 = vector.load %arg1[%c0_16, %c0_17, %c0_18] : memref<2x256x8xf32, #tpu.memory_space<vmem>>, vector<2x256x8xf32>
    %30 = vector.shape_cast %28 : vector<2x8xf32> to vector<2x1x8xf32>
    %31 = vector.broadcast %30 : vector<2x1x8xf32> to vector<2x256x8xf32>
    %32 = arith.mulf %29, %31 : vector<2x256x8xf32>
    %cst_19 = arith.constant dense<0.000000e+00> : vector<2x256xf32>
    %33 = vector.multi_reduction <add>, %32, %cst_19 [2] : vector<2x256x8xf32> to vector<2x256xf32>
    %c0_20 = arith.constant 0 : index
    %c0_21 = arith.constant 0 : index
    %34 = vector.load %arg4[%c0_20, %c0_21] : memref<2x256xf32, #tpu.memory_space<vmem>>, vector<2x256xf32>
    tpu.vector_store %arg4[%c0_20, %c0_21], %33 {strides = array<i32>} : memref<2x256xf32, #tpu.memory_space<vmem>>, vector<2x256xf32>,
    return
  }
  func.func @transform_0(%arg0: i32) -> (i32, i32, i32) {
    %c0_i32 = arith.constant 0 : i32
    %c0_i32_0 = arith.constant 0 : i32
    %c0_i32_1 = arith.constant 0 : i32
    return %arg0, %c0_i32, %c0_i32_0 : i32, i32, i32
  }
  func.func @transform_1(%arg0: i32) -> (i32, i32) {
    %c0_i32 = arith.constant 0 : i32
    %c0_i32_0 = arith.constant 0 : i32
    %c0_i32_1 = arith.constant 0 : i32
    return %c0_i32, %c0_i32_0 : i32, i32
  }
  func.func @transform_2(%arg0: i32) -> (i32, i32) {
    %c0_i32 = arith.constant 0 : i32
    %c0_i32_0 = arith.constant 0 : i32
    %c0_i32_1 = arith.constant 0 : i32
    return %c0_i32, %c0_i32_0 : i32, i32
  }
  func.func @transform_3(%arg0: i32) -> (i32, i32) {
    %c0_i32 = arith.constant 0 : i32
    %c0_i32_0 = arith.constant 0 : i32
    return %arg0, %c0_i32 : i32, i32
  }
}

</mosaic_0001>

<bundles_post_ra>
// kernel: tpu_custom_call.1
= control target key start
LH: loop header
LB: loop body
LE: loop exit
PB: predicated region body
PF: predicated region fallthrough
CT: control target
= control target key end

     0   :  { %s6357_s0 = inlined_call_operand.vmem [shape: f32[2,256,8], index: 0, kind: input, shape index: {}]   ;;  %s6358_s1 = inlined_call_operand.vmem [shape: bf16[256,256], index: 1, kind: input, shape index: {}]   ;;  %s6359_s2 = inlined_call_operand.vmem [shape: f32[1,256], index: 2, kind: input, shape index: {}]   ;;  %s6360_s3 = inlined_call_operand.hbm [shape: f32[2,256], index: 3, kind: output, shape index: {}]  }
   0x1   :  { %v4679_v0 = vld [vmem:[%s6357_s0 + $0x80] sm:$0xff]  ;;  %v4698_v5 = vld [vmem:[%s6357_s0 + $0x88] sm:$0xff]  ;;  %v4724_v12 = vld [vmem:[%s6357_s0 + $0x90] sm:$0xff] }
   0x2   :  { %v4431_v1 = vld [vmem:[%s6357_s0 + $0x180] sm:$0xff]  ;;  %v4703_v6 = vld [vmem:[%s6357_s0 + $0x188] sm:$0xff]  ;;  %v4433_v13 = vld [vmem:[%s6357_s0 + $0x190] sm:$0xff] }
   0x3   :  { %v4687_v2 = vld [vmem:[%s6357_s0] sm:$0xff]  ;;  %v4487_v3 = vpack.i.bf16 %v4431_v1, %v4679_v0  ;;  %6382 = vst [vmem:[#allocation7_spill] sm:$0xff] %v4703_v6  ;;  %v4710_v8 = vld [vmem:[%s6357_s0 + $0x8] sm:$0xff]  ;;  %v4489_v10 = vpack.i.bf16 %v4703_v6, %v4698_v5  ;;  %v4732_v14 = vld [vmem:[%s6357_s0 + $0x10] sm:$0xff]  ;;  %v4491_v16 = vpack.i.bf16 %v4433_v13, %v4724_v12 }
   0x4   :  { %v4693_v4 = vld [vmem:[%s6357_s0 + $0x100] sm:$0xff]  ;;  %v4715_v9 = vld [vmem:[%s6357_s0 + $0x108] sm:$0xff]  ;;  %v4737_v15 = vld [vmem:[%s6357_s0 + $0x110] sm:$0xff] }
   0x5   :  { %6381 = vst [vmem:[#allocation6_spill] sm:$0xff] %v4693_v4  ;;  %v4524_v7 = vpack.i.bf16 %v4693_v4, %v4687_v2  ;;  %4488 = vxpose.xlu0.b32.start [1/16] (narrow) %v4487_v3, 8  ;;  %v4526_v11 = vpack.i.bf16 %v4715_v9, %v4710_v8  ;;  %6383 = vst [vmem:[#allocation8_spill] sm:$0xff] %v4737_v15  ;;  %v4528_v17 = vpack.i.bf16 %v4737_v15, %v4732_v14  ;;  %v4745_v18 = vld [vmem:[%s6357_s0 + $0x98] sm:$0xff]  ;;  %v4769_v24 = vld [vmem:[%s6357_s0 + $0xa0] sm:$0xff] }
   0x6   :  { %v4750_v19 = vld [vmem:[%s6357_s0 + $0x198] sm:$0xff]  ;;  %v4774_v25 = vld [vmem:[%s6357_s0 + $0x1a0] sm:$0xff]  ;;  %v4793_v30 = vld [vmem:[%s6357_s0 + $0xa8] sm:$0xff] }
   0x7   :  { %4525 = vxpose.xlu1.b32.start [1/16] (narrow) %v4524_v7, 8  ;;  %6384 = vst [vmem:[#allocation9_spill] sm:$0xff] %v4750_v19  ;;  %v4755_v20 = vld [vmem:[%s6357_s0 + $0x18] sm:$0xff]  ;;  %v4493_v22 = vpack.i.bf16 %v4750_v19, %v4745_v18  ;;  %v4779_v26 = vld [vmem:[%s6357_s0 + $0x20] sm:$0xff]  ;;  %v4495_v28 = vpack.i.bf16 %v4774_v25, %v4769_v24  ;;  %v4798_v31 = vld [vmem:[%s6357_s0 + $0x1a8] sm:$0xff] }
   0x8   :  { %v4760_v21 = vld [vmem:[%s6357_s0 + $0x118] sm:$0xff]  ;;  %v4784_v27 = vld [vmem:[%s6357_s0 + $0x120] sm:$0xff]  ;;  %6386 = vst [vmem:[#allocation11_spill] sm:$0xff] %v4798_v31  ;;  %v4803_v32 = vld [vmem:[%s6357_s0 + $0x28] sm:$0xff]  ;;  %v4497_v34 = vpack.i.bf16 %v4798_v31, %v4793_v30 }
   0x9   :  { %4490 = vxpose.xlu0.b32.cont [2/16] (narrow) %v4489_v10, 8  ;;  %v4530_v23 = vpack.i.bf16 %v4760_v21, %v4755_v20  ;;  %6385 = vst [vmem:[#allocation10_spill] sm:$0xff] %v4784_v27  ;;  %v4532_v29 = vpack.i.bf16 %v4784_v27, %v4779_v26  ;;  %v4808_v33 = vld [vmem:[%s6357_s0 + $0x128] sm:$0xff]  ;;  %v4817_v36 = vld [vmem:[%s6357_s0 + $0xb0] sm:$0xff]  ;;  %v4837_v40 = vld [vmem:[%s6357_s0 + $0xb8] sm:$0xff] }
   0xa   :  { %v4534_v35 = vpack.i.bf16 %v4808_v33, %v4803_v32  ;;  %v4822_v37 = vld [vmem:[%s6357_s0 + $0x1b0] sm:$0xff]  ;;  %v4842_v41 = vld [vmem:[%s6357_s0 + $0x1b8] sm:$0xff]  ;;  %v4563_v42 = vld [vmem:[%s6358_s1 + $0x4] ss:$8 sps:$4 sm:$0xff]  }
   0xb   :  { %4527 = vxpose.xlu1.b32.cont [2/16] (narrow) %v4526_v11, 8  ;;  %v4827_v38 = vld [vmem:[%s6357_s0 + $0x30] sm:$0xff]  ;;  %6388 = vst [vmem:[#allocation13_spill] sm:$0xff] %v4842_v41  ;;  %v4565_v43 = vld [vmem:[%s6358_s1] ss:$8 sps:$4 sm:$0xff]   ;;  %v4499_v44 = vpack.i.bf16 %v4822_v37, %v4817_v36  ;;  %v4855_v45 = vld [vmem:[%s6357_s0 + $0x38] sm:$0xff]  ;;  %410 = vmatprep.subr.bf16.mxu0 %v4563_v42  ;;  %v4501_v52 = vpack.i.bf16 %v4842_v41, %v4837_v40 }
   0xc   :  { %v4832_v39 = vld [vmem:[%s6357_s0 + $0x130] sm:$0xff]  ;;  %v4865_v48 = vld [vmem:[%s6357_s0 + $0x138] sm:$0xff]  ;;  %411 = vmatpush1.bf16.msra.mxu0 %v4565_v43  ;;  %v4873_v50 = vld [vmem:[%s6357_s0 + $0xc0] sm:$0xff] }
   0xd   :  { %4492 = vxpose.xlu0.b32.cont [3/16] (narrow) %v4491_v16, 8  ;;  %6387 = vst [vmem:[#allocation12_spill] sm:$0xff] %v4832_v39  ;;  %v4566_v46 = vld [vmem:[%s6358_s1 + $0x14] ss:$8 sps:$4 sm:$0xff]   ;;  %v4536_v47 = vpack.i.bf16 %v4832_v39, %v4827_v38  ;;  %v4568_v49 = vld [vmem:[%s6358_s1 + $0x10] ss:$8 sps:$4 sm:$0xff]   ;;  %v4538_v55 = vpack.i.bf16 %v4865_v48, %v4855_v45 }
   0xe   :  { %412 = vmatprep.subr.bf16.mxu0 %v4566_v46  ;;  %v4569_v51 = vld [vmem:[%s6358_s1 + $0x24] ss:$8 sps:$4 sm:$0xff]   ;;  %v4571_v57 = vld [vmem:[%s6358_s1 + $0x20] ss:$8 sps:$4 sm:$0xff]   ;;  %v4572_v59 = vld [vmem:[%s6358_s1 + $0x34] ss:$8 sps:$4 sm:$0xff]  }
   0xf   :  { %4529 = vxpose.xlu1.b32.cont [3/16] (narrow) %v4528_v17, 8  ;;  %v4883_v53 = vld [vmem:[%s6357_s0 + $0x1c0] sm:$0xff]  ;;  %v4903_v58 = vld [vmem:[%s6357_s0 + $0xc8] sm:$0xff]  ;;  %v4574_v3 = vld [vmem:[%s6358_s1 + $0x30] ss:$8 sps:$4 sm:$0xff]  }
  0x10   :  { %v4888_v54 = vld [vmem:[%s6357_s0 + $0x40] sm:$0xff]  ;;  %413 = vmatpush1.bf16.msra.mxu0 %v4568_v49  ;;  %v4503_v60 = vpack.i.bf16 %v4883_v53, %v4873_v50  ;;  %v4913_v61 = vld [vmem:[%s6357_s0 + $0x1c8] sm:$0xff]  ;;  %v4933_v7 = vld [vmem:[%s6357_s0 + $0xd0] sm:$0xff] }
  0x11   :  { %4494 = vxpose.xlu0.b32.cont [4/16] (narrow) %v4493_v22, 8  ;;  %v4895_v56 = vld [vmem:[%s6357_s0 + $0x140] sm:$0xff]  ;;  %414 = vmatprep.subr.bf16.mxu0 %v4569_v51  ;;  %6390 = vst [vmem:[#allocation15_spill] sm:$0xff] %v4913_v61  ;;  %v4918_v62 = vld [vmem:[%s6357_s0 + $0x48] sm:$0xff]  ;;  %v4505_v11 = vpack.i.bf16 %v4913_v61, %v4903_v58  ;;  %v4943_v13 = vld [vmem:[%s6357_s0 + $0x1d0] sm:$0xff] }
  0x12   :  { %6389 = vst [vmem:[#allocation14_spill] sm:$0xff] %v4895_v56  ;;  %v4540_v63 = vpack.i.bf16 %v4895_v56, %v4888_v54  ;;  %v4925_v1 = vld [vmem:[%s6357_s0 + $0x148] sm:$0xff]  ;;  %v4948_v16 = vld [vmem:[%s6357_s0 + $0x50] sm:$0xff]  ;;  %v4978_v42 = vld [vmem:[%s6357_s0 + $0x58] sm:$0xff] }
  0x13   :  { %4531 = vxpose.xlu1.b32.cont [4/16] (narrow) %v4530_v23, 8  ;;  %v4575_v10 = vld [vmem:[%s6358_s1 + $0x44] ss:$8 sps:$4 sm:$0xff]   ;;  %v4542_v17 = vpack.i.bf16 %v4925_v1, %v4918_v62  ;;  %v4955_v22 = vld [vmem:[%s6357_s0 + $0x150] sm:$0xff]  ;;  %v4577_v23 = vld [vmem:[%s6358_s1 + $0x40] ss:$8 sps:$4 sm:$0xff]  }
  0x14   :  { %415 = vmatpush1.bf16.msra.mxu0 %v4571_v57  ;;  %6391 = vst [vmem:[#allocation16_spill] sm:$0xff] %v4955_v22  ;;  %v4544_v43 = vpack.i.bf16 %v4955_v22, %v4948_v16  ;;  %v4580_v46 = vld [vmem:[%s6358_s1 + $0x50] ss:$8 sps:$4 sm:$0xff]  }
  0x15   :  { %4496 = vxpose.xlu0.b32.cont [5/16] (narrow) %v4495_v28, 8  ;;  %416 = vmatprep.subr.bf16.mxu0 %v4572_v59  ;;  %v4963_v28 = vld [vmem:[%s6357_s0 + $0xd8] sm:$0xff] }
  0x17   :  { %4533 = vxpose.xlu1.b32.cont [5/16] (narrow) %v4532_v29, 8  ;;  %v4578_v29 = vld [vmem:[%s6358_s1 + $0x54] ss:$8 sps:$4 sm:$0xff]  }
  0x18   :  { %417 = vmatpush1.bf16.msra.mxu0 %v4574_v3 }
  0x19   :  { %4498 = vxpose.xlu0.b32.cont [6/16] (narrow) %v4497_v34, 8  ;;  %418 = vmatprep.subr.bf16.mxu0 %v4575_v10  ;;  %v4507_v34 = vpack.i.bf16 %v4943_v13, %v4933_v7 }
  0x1b   :  { %4535 = vxpose.xlu1.b32.cont [6/16] (narrow) %v4534_v35, 8  ;;  %v4973_v35 = vld [vmem:[%s6357_s0 + $0x1d8] sm:$0xff] }
  0x1c   :  { %6392 = vst [vmem:[#allocation17_spill] sm:$0xff] %v4973_v35  ;;  %419 = vmatpush1.bf16.msra.mxu0 %v4577_v23 }
  0x1d   :  { %4500 = vxpose.xlu0.b32.cont [7/16] (narrow) %v4499_v44, 8  ;;  %v4985_v44 = vld [vmem:[%s6357_s0 + $0x158] sm:$0xff]  ;;  %420 = vmatprep.subr.bf16.mxu0 %v4578_v29 }
  0x1f   :  { %4537 = vxpose.xlu1.b32.cont [7/16] (narrow) %v4536_v47, 8  ;;  %v4581_v47 = vld [vmem:[%s6358_s1 + $0x64] ss:$8 sps:$4 sm:$0xff]  }
  0x21   :  { %4502 = vxpose.xlu0.b32.cont [8/16] (narrow) %v4501_v52, 8 }
  0x23   :  { %4539 = vxpose.xlu1.b32.cont [8/16] (narrow) %v4538_v55, 8 }
  0x25   :  { %4504 = vxpose.xlu0.b32.cont [9/16] (narrow) %v4503_v60, 8 }
  0x27   :  { %4541 = vxpose.xlu1.b32.cont [9/16] (narrow) %v4540_v63, 8 }
  0x29   :  { %4506 = vxpose.xlu0.b32.cont [10/16] (narrow) %v4505_v11, 8 }
  0x2b   :  { %4543 = vxpose.xlu1.b32.cont [10/16] (narrow) %v4542_v17, 8 }
  0x2c   :  { %8 = vsyncpa [#allocation4], 0  ;;  %v4509_v49 = vpack.i.bf16 %v4973_v35, %v4963_v28  ;;  %v4546_v51 = vpack.i.bf16 %v4985_v44, %v4978_v42  ;;  %v5000_v52 = vld [vmem:[%s6357_s0 + $0xe0] sm:$0xff]  ;;  %421 = vmatpush1.bf16.msra.mxu0 %v4580_v46  ;;  %v4584_v63 = vld [vmem:[%s6358_s1 + $0x74] ss:$8 sps:$4 sm:$0xff]   ;;  %vm491_vm0 = vcmask 1041409  }
  0x2d   :  { %4508 = vxpose.xlu0.b32.cont [11/16] (narrow) %v4507_v34, 8  ;;  %v5005_v55 = vld [vmem:[%s6357_s0 + $0x1e0] sm:$0xff]  ;;  %422 = vmatprep.subr.bf16.mxu0 %v4581_v47  ;;  %v5030_v11 = vld [vmem:[%s6357_s0 + $0xe8] sm:$0xff]  ;;  %v4586_v34 = vld [vmem:[%s6358_s1 + $0x70] ss:$8 sps:$4 sm:$0xff]   ;;  %vm494_vm1 = vcmask 58368  }
  0x2e   :  { %v5010_v57 = vld [vmem:[%s6357_s0 + $0x60] sm:$0xff]  ;;  %v4511_v3 = vpack.i.bf16 %v5005_v55, %v5000_v52  ;;  %v5035_v17 = vld [vmem:[%s6357_s0 + $0x1e8] sm:$0xff]  ;;  %vm714_vm2 = vcmask 64512   ;;  %vm4052_vm3 = vcmask 130112   ;;  %vm4059_vm4 = vcmask 195712  }
  0x2f   :  { %4545 = vxpose.xlu1.b32.cont [11/16] (narrow) %v4544_v43, 8  ;;  %v5015_v59 = vld [vmem:[%s6357_s0 + $0x160] sm:$0xff]  ;;  %6394 = vst [vmem:[#allocation19_spill] sm:$0xff] %v5035_v17  ;;  %v5040_v23 = vld [vmem:[%s6357_s0 + $0x68] sm:$0xff]  ;;  %v4513_v46 = vpack.i.bf16 %v5035_v17, %v5030_v11  ;;  %vm4066_vm5 = vcmask 261312   ;;  %vm4073_vm6 = vcmask 326912  }
  0x30   :  { %6393 = vst [vmem:[#allocation18_spill] sm:$0xff] %v5015_v59  ;;  %v4583_v60 = vld [vmem:[%s6358_s1 + $0x60] ss:$8 sps:$4 sm:$0xff]   ;;  %v4548_v10 = vpack.i.bf16 %v5015_v59, %v5010_v57  ;;  %v4587_v43 = vld [vmem:[%s6358_s1 + $0x84] ss:$8 sps:$4 sm:$0xff]   ;;  %vm4080_vm7 = vcmask 392512  }
  0x31   :  { %4510 = vxpose.xlu0.b32.cont [12/16] (narrow) %v4509_v49, 8  ;;  %v5045_v29 = vld [vmem:[%s6357_s0 + $0x168] sm:$0xff]  ;;  %423 = vmatpush1.bf16.msra.mxu0 %v4583_v60  ;;  %v5060_v49 = vld [vmem:[%s6357_s0 + $0xf0] sm:$0xff]  ;;  %vm4087_vm8 = vcmask 458112   ;;  %vm4094_vm9 = vcmask 523712   ;;  %vm4101_vm10 = vcmask 589312  }
  0x32   :  { %6395 = vst [vmem:[#allocation20_spill] sm:$0xff] %v5045_v29  ;;  %424 = vmatprep.subr.bf16.mxu0 %v4584_v63  ;;  %v4550_v47 = vpack.i.bf16 %v5045_v29, %v5040_v23  ;;  %v5070_v60 = vld [vmem:[%s6357_s0 + $0x70] sm:$0xff]  ;;  %v4593_v59 = vld [vmem:[%s6358_s1 + $0xa4] ss:$8 sps:$4 sm:$0xff]   ;;  %vm4108_vm11 = vcmask 654912   ;;  %vm4115_vm12 = vcmask 720512  }
  0x33   :  { %4547 = vxpose.xlu1.b32.cont [12/16] (narrow) %v4546_v51, 8  ;;  %v5065_v51 = vld [vmem:[%s6357_s0 + $0x1f0] sm:$0xff]  ;;  %vm4122_vm13 = vcmask 786112   ;;  %vm4129_vm14 = vcmask 851712   ;;  %vm4136_vm15 = vcmask 917312  }
  0x34   :  { %v5075_v63 = vld [vmem:[%s6357_s0 + $0x170] sm:$0xff]  ;;  %v4515_v17 = vpack.i.bf16 %v5065_v51, %v5060_v49 }
  0x35   :  { %4512 = vxpose.xlu0.b32.cont [13/16] (narrow) %v4511_v3, 8  ;;  %6396 = vst [vmem:[#allocation21_spill] sm:$0xff] %v5075_v63  ;;  %425 = vmatpush1.bf16.msra.mxu0 %v4586_v34  ;;  %v4589_v3 = vld [vmem:[%s6358_s1 + $0x80] ss:$8 sps:$4 sm:$0xff]   ;;  %v4552_v35 = vpack.i.bf16 %v5075_v63, %v5070_v60  ;;  %v5090_v34 = vld [vmem:[%s6357_s0 + $0xf8] sm:$0xff] }
  0x36   :  { %426 = vmatprep.subr.bf16.mxu0 %v4587_v43  ;;  %v5095_v43 = vld [vmem:[%s6357_s0 + $0x1f8] sm:$0xff] }
  0x37   :  { %4549 = vxpose.xlu1.b32.cont [13/16] (narrow) %v4548_v10, 8  ;;  %v4590_v10 = vld [vmem:[%s6358_s1 + $0x94] ss:$8 sps:$4 sm:$0xff]   ;;  %6397 = vst [vmem:[#allocation22_spill] sm:$0xff] %v5095_v43  ;;  %v4592_v63 = vld [vmem:[%s6358_s1 + $0x90] ss:$8 sps:$4 sm:$0xff]   ;;  %v4517_v61 = vpack.i.bf16 %v5095_v43, %v5090_v34 }
  0x39   :  { %4514 = vxpose.xlu0.b32.cont [14/16] (narrow) %v4513_v46, 8  ;;  %v5100_v46 = vld [vmem:[%s6357_s0 + $0x78] sm:$0xff]  ;;  %427 = vmatpush1.bf16.msra.mxu0 %v4589_v3  ;;  %v4595_v3 = vld [vmem:[%s6358_s1 + $0xa0] ss:$8 sps:$4 sm:$0xff]  }
  0x3a   :  { %428 = vmatprep.subr.bf16.mxu0 %v4590_v10  ;;  %v4596_v10 = vld [vmem:[%s6358_s1 + $0xb4] ss:$8 sps:$4 sm:$0xff]  }
  0x3b   :  { %4551 = vxpose.xlu1.b32.cont [14/16] (narrow) %v4550_v47, 8  ;;  %v5105_v47 = vld [vmem:[%s6357_s0 + $0x178] sm:$0xff] }
  0x3c   :  { %6398 = vst [vmem:[#allocation23_spill] sm:$0xff] %v5105_v47  ;;  %v4554_v22 = vpack.i.bf16 %v5105_v47, %v5100_v46 }
  0x3d   :  { %4516 = vxpose.xlu0.b32.cont [15/16] (narrow) %v4515_v17, 8  ;;  %429 = vmatpush1.bf16.msra.mxu0 %v4592_v63  ;;  %v4599_v17 = vld [vmem:[%s6358_s1 + $0xc4] ss:$8 sps:$4 sm:$0xff]  }
  0x3e   :  { %430 = vmatprep.subr.bf16.mxu0 %v4593_v59  ;;  %v4601_v59 = vld [vmem:[%s6358_s1 + $0xc0] ss:$8 sps:$4 sm:$0xff]   ;;  %v4605_v63 = vld [vmem:[%s6358_s1 + $0xe4] ss:$8 sps:$4 sm:$0xff]  }
  0x3f   :  { %4553 = vxpose.xlu1.b32.cont [15/16] (narrow) %v4552_v35, 8  ;;  %v4598_v35 = vld [vmem:[%s6358_s1 + $0xb0] ss:$8 sps:$4 sm:$0xff]  }
  0x41   :  { %4518 = vxpose.xlu0.b32.end [16/16] (narrow) %v4517_v61, 8  ;;  %431 = vmatpush1.bf16.msra.mxu0 %v4595_v3  ;;  %v4602_v61 = vld [vmem:[%s6358_s1 + $0xd4] ss:$8 sps:$4 sm:$0xff]   ;;  %v4607_v3 = vld [vmem:[%s6358_s1 + $0xe0] ss:$8 sps:$4 sm:$0xff]  }
  0x42   :  { %432 = vmatprep.subr.bf16.mxu0 %v4596_v10  ;;  %v4608_v10 = vld [vmem:[%s6358_s1 + $0xf4] ss:$8 sps:$4 sm:$0xff]  }
  0x43   :  { %4555 = vxpose.xlu1.b32.end [16/16] (narrow) %v4554_v22, 8  ;;  %v4604_v22 = vld [vmem:[%s6358_s1 + $0xd0] ss:$8 sps:$4 sm:$0xff]  }
  0x45   :  { %433 = vmatpush1.bf16.msra.mxu0 %v4598_v35  ;;  %v4610_v35 = vld [vmem:[%s6358_s1 + $0xf0] ss:$8 sps:$4 sm:$0xff]  }
  0x46   :  { %434 = vmatprep.subr.bf16.mxu0 %v4599_v17 }
  0x49   :  { %435 = vmatpush1.bf16.msra.mxu0 %v4601_v59 }
  0x4a   :  { %436 = vmatprep.subr.bf16.mxu0 %v4602_v61 }
  0x4d   :  { %437 = vmatpush1.bf16.msra.mxu0 %v4604_v22 }
  0x4e   :  { %438 = vmatprep.subr.bf16.mxu0 %v4605_v63  ;;  %v459_v63 = vlaneseq }
  0x50   :  { %v5150_v19 = vshrl.u32 %v459_v63, 7  ;;  %v5157_v47 = vand.u32 127, %v459_v63 }
  0x51   :  { %439 = vmatpush1.bf16.msra.mxu0 %v4607_v3 }
  0x52   :  { %440 = vmatprep.subr.bf16.mxu0 %v4608_v10  ;;  %6399 = vst [vmem:[#allocation24_spill] sm:$0xff] %v5157_v47  ;;  %v5161_v4 = vsub.s32 %v5157_v47, %v5150_v19 }
  0x55   :  { %441 = vmatpush1.bf16.msra.mxu0 %v4610_v35  ;;  %v461_v35 = vsub.s32 0, %v5150_v19 }
  0x85   :  { %v4519_v17 = vpop.trf.xlu0 }
  0x86   :  { %v4523_v61 = vunpack.i.h.bf16 %v4519_v17  ;;  %v4520_v22 = vunpack.i.l.bf16 %v4519_v17  ;;  %v457_v17 = vld [vmem:[%s6359_s2] sm:$0x3] }
  0x87   :  { %v4556_v59 = vpop.trf.xlu1 }
  0x88   :  { %v4560_v43 = vunpack.i.h.bf16 %v4556_v59  ;;  %v4557_v41 = vunpack.i.l.bf16 %v4556_v59  ;;  %v217_v56 = vpack.c.bf16 %v4523_v61, %v4520_v22 }
  0x8a   :  { %v216_v31 = vpack.c.bf16 %v4560_v43, %v4557_v41  ;;  %442 = vmatprep.mubr.bf16.mxu0 %v217_v56  ;;  %v465_v41 = vsub.s32 1, %v5150_v19 }
  0x8c   :  { %443 = vmatmul.mubr.bf16.vlgmr.msra.gmra.mrb[0].mxu0 %v216_v31  ;;  %v462_v31 = vrot.slane %v457_v17, %v461_v35  ;;  %v466_v56 = vrot.slane %v457_v17, %v465_v41 }
 0x15f   :  { %v444_v39 = vpop.f32.mrb[0].mxu0 }
 0x160   :  { %4611 = vtanh.f32 %v444_v39  ;;  %v446_v3 = vpop.f32.mrb[1].mxu0 }
 0x161   :  { %4613 = vtanh.f32 %v446_v3  ;;  %v448_v27 = vpop.f32.mrb[2].mxu0 }
 0x162   :  { %4615 = vtanh.f32 %v448_v27  ;;  %v450_v10 = vpop.f32.mrb[3].mxu0 }
 0x163   :  { %4617 = vtanh.f32 %v450_v10 }
 0x16a   :  { %v4612_v43 = vpop.eup %4611 }
 0x16b   :  { %v4614_v59 = vpop.eup %4613  ;;  %v469_v61 = vmul.f32 %v4612_v43, %v462_v31 }
 0x16c   :  { %v4616_v39 = vpop.eup %4615  ;;  %v470_v22 = vmul.f32 %v4614_v59, %v466_v56 }
 0x16d   :  { %v4618_v3 = vpop.eup %4617  ;;  %v471_v6 = vmul.f32 %v4616_v39, %v462_v31 }
 0x16e   :  { %v473_v27 = vadd.f32 %v470_v22, %v469_v61  ;;  %v472_v15 = vmul.f32 %v4618_v3, %v466_v56 }
 0x170   :  { %474 = vadd.xlane.f32.xlu0 %v473_v27  ;;  %v476_v10 = vadd.f32 %v472_v15, %v471_v6  ;;  %v4649_v6 = vmov 0  }
 0x171   :  { %4562 = vset.pattern.permute.xlu0 %v4649_v6  ;;  %4561 = vset.pattern.permute.xlu1 %v4649_v6 }
 0x172   :  { %477 = vadd.xlane.f32.xlu1 %v476_v10 }
 0x1fd   :  { %v475_v29 = vpop.xlane.xlu0 %474 }
 0x1fe   :  { %v486_v43 = vrot.slane %v475_v29, %v5161_v4 }
 0x1ff   :  { %v478_v17 = vpop.xlane.xlu1 %477 }
 0x200   :  { %v490_v59 = vrot.slane %v478_v17, %v5161_v4 }
 0x202   :  { %v492_v31 = vsel %vm491_vm0, %v490_v59, %v486_v43 }
 0x203   :  { %v495_v56 = vsel %vm494_vm1, %v492_v31, -inf }
 0x204   :  { %496 = vmax.xlane.f32.xlu1 %v495_v56 }
 0x291   :  { %v497_v15 = vpop.xlane.xlu1 %496 }
 0x292   :  { %v502_v63 = vrot.slane %v497_v15, %v461_v35  ;;  %v506_v61 = vrot.slane %v497_v15, %v465_v41 }
 0x294   :  { %v509_v39 = vsub.f32 %v475_v29, %v502_v63  ;;  %v510_v22 = vsub.f32 %v478_v17, %v506_v61 }
 0x296   :  { %v511_v3 = vmul.f32 1.442695, %v509_v39  ;;  %v513_v27 = vmul.f32 1.442695, %v510_v22 }
 0x298   :  { %4619 = vpow2.f32 %v511_v3 }
 0x299   :  { %4621 = vpow2.f32 %v513_v27 }
 0x2a2   :  { %v4620_v10 = vpop.eup %4619 }
 0x2a3   :  { %v4622_v47 = vpop.eup %4621  ;;  %518 = vperm.xlu1 %4561, %v4620_v10  }
 0x2a4   :  { %521 = vperm.xlu0 %4562, %v4622_v47  }
 0x322   :  { %v519_v43 = vpop.permute.xlu1 %518 }
 0x323   :  { %v522_v59 = vpop.permute.xlu0 %521  ;;  %v526_v31 = vrot.slane %v519_v43, %v5161_v4 }
 0x324   :  { %v530_v56 = vrot.slane %v522_v59, %v5161_v4 }
 0x326   :  { %v531_v6 = vsel %vm491_vm0, %v530_v56, %v526_v31 }
 0x327   :  { %v533_v15 = vsel %vm494_vm1, %v531_v6, 0.0  ;;  %vm4143_vm1 = vcmask 982912  }
 0x328   :  { %534 = vadd.xlane.f32.xlu1 %v533_v15 }
 0x3b5   :  { %v535_v29 = vpop.xlane.xlu1 %534 }
 0x3b6   :  { %4623 = vrcp.f32 %v535_v29 }
 0x3c0   :  { %v4624_v17 = vpop.eup %4623 }
 0x3c1   :  { %v541_v63 = vrot.slane %v4624_v17, %v461_v35  ;;  %v545_v39 = vrot.slane %v4624_v17, %v465_v41 }
 0x3c3   :  { %v548_v61 = vmul.f32 %v4620_v10, %v541_v63  ;;  %v549_v22 = vmul.f32 %v4622_v47, %v545_v39 }
 0x3c5   :  { %617 = vperm.xlu0 %4562, %v548_v61  }
 0x3c9   :  { %620 = vperm.xlu0 %4562, %v549_v22  }
 0x444   :  { %v618_v3 = vpop.permute.xlu0 %617 }
 0x445   :  { %v5172_v27 = vrot.slane %v618_v3, %v5161_v4 }
 0x447   :  { %v651_v43 = vmul.f32 %v5172_v27, %v4710_v8  ;;  %v650_v59 = vmul.f32 %v5172_v27, %v4687_v2  ;;  %v659_v41 = vmul.f32 %v5172_v27, %v4918_v62  ;;  %v652_v47 = vmul.f32 %v5172_v27, %v4732_v14 }
 0x448   :  { %v661_v8 = vmul.f32 %v5172_v27, %v4978_v42  ;;  %v653_v2 = vmul.f32 %v5172_v27, %v4755_v20  ;;  %v663_v14 = vmul.f32 %v5172_v27, %v5040_v23  ;;  %v654_v15 = vmul.f32 %v5172_v27, %v4779_v26 }
 0x449   :  { %v718_v31 = vsel %vm714_vm2, %v651_v43, 0.0  ;;  %v715_v35 = vsel %vm714_vm2, %v650_v59, 0.0  ;;  %v742_v10 = vsel %vm714_vm2, %v659_v41, 0.0  ;;  %v721_v56 = vsel %vm714_vm2, %v652_v47, 0.0 }
 0x44a   :  { %719 = vadd.xlane.f32.xlu0 %v718_v31  ;;  %716 = vadd.xlane.f32.xlu1 %v715_v35  ;;  %v748_v6 = vsel %vm714_vm2, %v661_v8, 0.0  ;;  %v724_v62 = vsel %vm714_vm2, %v653_v2, 0.0  ;;  %v754_v29 = vsel %vm714_vm2, %v663_v14, 0.0  ;;  %v727_v42 = vsel %vm714_vm2, %v654_v15, 0.0 }
 0x44b   :  { %v665_v20 = vmul.f32 %v5172_v27, %v5100_v46  ;;  %v655_v17 = vmul.f32 %v5172_v27, %v4803_v32  ;;  %v676_v23 = vmul.f32 %v5172_v27, %v4933_v7  ;;  %v678_v26 = vmul.f32 %v5172_v27, %v5000_v52  ;;  %v621_v52 = vpop.permute.xlu0 %620 }
 0x44c   :  { %v667_v63 = vmul.f32 %v5172_v27, %v4698_v5  ;;  %v656_v61 = vmul.f32 %v5172_v27, %v4827_v38  ;;  %v680_v46 = vmul.f32 %v5172_v27, %v5060_v49  ;;  %v669_v3 = vmul.f32 %v5172_v27, %v4745_v18 }
 0x44d   :  { %v760_v39 = vsel %vm714_vm2, %v665_v20, 0.0  ;;  %v730_v32 = vsel %vm714_vm2, %v655_v17, 0.0  ;;  %v5215_v22 = vsel %vm714_vm2, %v676_v23, 0.0  ;;  %v5218_v7 = vsel %vm714_vm2, %v678_v26, 0.0 }
 0x44e   :  { %743 = vadd.xlane.f32.xlu0 %v742_v10  ;;  %722 = vadd.xlane.f32.xlu1 %v721_v56  ;;  %v5221_v5 = vsel %vm714_vm2, %v680_v46, 0.0  ;;  %v766_v38 = vsel %vm714_vm2, %v667_v63, 0.0  ;;  %v733_v49 = vsel %vm714_vm2, %v656_v61, 0.0  ;;  %v657_v43 = vmul.f32 %v5172_v27, %v4855_v45 }
 0x44f   :  { %v5230_v59 = vrot.slane %v621_v52, %v5161_v4  ;;  %v671_v31 = vmul.f32 %v5172_v27, %v4793_v30  ;;  %v658_v35 = vmul.f32 %v5172_v27, %v4888_v54  ;;  %v772_v41 = vsel %vm714_vm2, %v669_v3, 0.0 }
 0x450   :  { %v736_v47 = vsel %vm714_vm2, %v657_v43, 0.0  ;;  %v673_v2 = vmul.f32 %v5172_v27, %v4837_v40  ;;  %v675_v14 = vmul.f32 %v5172_v27, %v4903_v58  ;;  %v662_v15 = vmul.f32 %v5172_v27, %v5010_v57 }
 0x451   :  { %v778_v18 = vsel %vm714_vm2, %v671_v31, 0.0  ;;  %v739_v45 = vsel %vm714_vm2, %v658_v35, 0.0  ;;  %v702_v10 = vmul.f32 %v4774_v25, %v5230_v59  ;;  %v704_v56 = vmul.f32 %v4822_v37, %v5230_v59 }
 0x452   :  { %749 = vadd.xlane.f32.xlu0 %v748_v6  ;;  %725 = vadd.xlane.f32.xlu1 %v724_v62  ;;  %v706_v30 = vmul.f32 %v4883_v53, %v5230_v59  ;;  %v708_v54 = vmul.f32 %v4943_v13, %v5230_v59  ;;  %v710_v8 = vmul.f32 %v5005_v55, %v5230_v59  ;;  %v784_v62 = vsel %vm714_vm2, %v673_v2, 0.0 }
 0x453   :  { %v660_v6 = vmul.f32 %v5172_v27, %v4948_v16  ;;  %v5255_v25 = vsel %vm714_vm2, %v702_v10, 0.0  ;;  %v712_v37 = vmul.f32 %v5065_v51, %v5230_v59  ;;  %v5260_v53 = vsel %vm714_vm2, %v704_v56, 0.0 }
 0x454   :  { %v5263_v13 = vsel %vm714_vm2, %v706_v30, 0.0  ;;  %v5266_v55 = vsel %vm714_vm2, %v708_v54, 0.0  ;;  %v5269_v40 = vsel %vm714_vm2, %v710_v8, 0.0  ;;  %v677_v20 = vmul.f32 %v5172_v27, %v4963_v28  ;;  %v6404_v30 = vld [vmem:[#allocation7_spill] sm:$0xff]  ;;  %v6405_v54 = vld [vmem:[#allocation10_spill] sm:$0xff] }
 0x455   :  { %v5272_v16 = vsel %vm714_vm2, %v712_v37, 0.0  ;;  %v745_v51 = vsel %vm714_vm2, %v660_v6, 0.0  ;;  %v664_v17 = vmul.f32 %v5172_v27, %v5070_v60  ;;  %v679_v57 = vmul.f32 %v5172_v27, %v5030_v11  ;;  %v6406_v37 = vld [vmem:[#allocation9_spill] sm:$0xff] }
 0x456   :  { %755 = vadd.xlane.f32.xlu0 %v754_v29  ;;  %728 = vadd.xlane.f32.xlu1 %v727_v42  ;;  %v790_v29 = vsel %vm714_vm2, %v675_v14, 0.0  ;;  %v751_v42 = vsel %vm714_vm2, %v662_v15, 0.0  ;;  %v796_v23 = vsel %vm714_vm2, %v677_v20, 0.0  ;;  %v666_v26 = vmul.f32 %v5172_v27, %v4679_v0 }
 0x457   :  { %v757_v58 = vsel %vm714_vm2, %v664_v17, 0.0  ;;  %v802_v63 = vsel %vm714_vm2, %v679_v57, 0.0  ;;  %v681_v60 = vmul.f32 %v5172_v27, %v5090_v34  ;;  %v668_v61 = vmul.f32 %v5172_v27, %v4724_v12  ;;  %v6409_v17 = vld [vmem:[#allocation14_spill] sm:$0xff] }
 0x458   :  { %v763_v28 = vsel %vm714_vm2, %v666_v26, 0.0  ;;  %v670_v0 = vmul.f32 %v5172_v27, %v4769_v24  ;;  %v672_v12 = vmul.f32 %v5172_v27, %v4817_v36  ;;  %v685_v52 = vmul.f32 %v4760_v21, %v5230_v59  ;;  %v6410_v26 = vld [vmem:[#allocation13_spill] sm:$0xff] }
 0x459   :  { %v808_v46 = vsel %vm714_vm2, %v681_v60, 0.0  ;;  %v769_v11 = vsel %vm714_vm2, %v668_v61, 0.0  ;;  %v689_v21 = vmul.f32 %v4865_v48, %v5230_v59  ;;  %v691_v31 = vmul.f32 %v4925_v1, %v5230_v59 }
 0x45a   :  { %761 = vadd.xlane.f32.xlu0 %v760_v39  ;;  %731 = vadd.xlane.f32.xlu1 %v730_v32  ;;  %v683_v39 = vmul.f32 %v4715_v9, %v5230_v59  ;;  %v775_v32 = vsel %vm714_vm2, %v670_v0, 0.0  ;;  %v820_v24 = vsel %vm714_vm2, %v685_v52, 0.0  ;;  %v674_v9 = vmul.f32 %v5172_v27, %v4873_v50  ;;  %v6400_v27 = vld [vmem:[#allocation20_spill] sm:$0xff]  ;;  %v6414_v52 = vld [vmem:[#allocation17_spill] sm:$0xff] }
 0x45b   :  { %v832_v43 = vsel %vm714_vm2, %v689_v21, 0.0  ;;  %v693_v50 = vmul.f32 %v4985_v44, %v5230_v59  ;;  %v695_v35 = vmul.f32 %v6400_v27, %v5230_v59  ;;  %v6402_v44 = vld [vmem:[#allocation23_spill] sm:$0xff]  ;;  %v686_v8 = vmul.f32 %v6405_v54, %v5230_v59  ;;  %v6417_v27 = vld [vmem:[#allocation22_spill] sm:$0xff] }
 0x45c   :  { %v814_v34 = vsel %vm714_vm2, %v683_v39, 0.0  ;;  %v787_v3 = vsel %vm714_vm2, %v674_v9, 0.0  ;;  %v6413_v39 = vld [vmem:[#allocation18_spill] sm:$0xff]  ;;  %v6416_v21 = vld [vmem:[#allocation19_spill] sm:$0xff] }
 0x45d   :  { %v844_v48 = vsel %vm714_vm2, %v693_v50, 0.0  ;;  %v850_v1 = vsel %vm714_vm2, %v695_v35, 0.0  ;;  %v823_v6 = vsel %vm714_vm2, %v686_v8, 0.0  ;;  %v713_v35 = vmul.f32 %v6417_v27, %v5230_v59 }
 0x45e   :  { %767 = vadd.xlane.f32.xlu0 %v766_v38  ;;  %734 = vadd.xlane.f32.xlu1 %v733_v49  ;;  %v781_v38 = vsel %vm714_vm2, %v672_v12, 0.0  ;;  %v687_v49 = vmul.f32 %v4808_v33, %v5230_v59  ;;  %v838_v33 = vsel %vm714_vm2, %v691_v31, 0.0 }
 0x460   :  { %v826_v36 = vsel %vm714_vm2, %v687_v49, 0.0  ;;  %v598_v49 = vld [vmem:[%s6357_s0 + $0x180] sm:$0xff] }
 0x461   :  { %v698_v31 = vmul.f32 %v5230_v59, %v598_v49 }
 0x462   :  { %773 = vadd.xlane.f32.xlu0 %v772_v41  ;;  %737 = vadd.xlane.f32.xlu1 %v736_v47  ;;  %v6401_v41 = vld [vmem:[#allocation6_spill] sm:$0xff] }
 0x463   :  { %v682_v47 = vmul.f32 %v6401_v41, %v5230_v59 }
 0x466   :  { %779 = vadd.xlane.f32.xlu0 %v778_v18  ;;  %740 = vadd.xlane.f32.xlu1 %v739_v45  ;;  %v697_v18 = vmul.f32 %v6402_v44, %v5230_v59 }
 0x468   :  { %v856_v10 = vsel %vm714_vm2, %v697_v18, 0.0  ;;  %v4651_v18 = vmov 842150450  }
 0x46a   :  { %785 = vadd.xlane.f32.xlu0 %v784_v62  ;;  %746 = vadd.xlane.f32.xlu1 %v745_v51  ;;  %v701_v62 = vmul.f32 %v6406_v37, %v5230_v59  ;;  %v6407_v51 = vld [vmem:[#allocation12_spill] sm:$0xff] }
 0x46b   :  { %v688_v14 = vmul.f32 %v6407_v51, %v5230_v59 }
 0x46c   :  { %v868_v15 = vsel %vm714_vm2, %v701_v62, 0.0 }
 0x46e   :  { %791 = vadd.xlane.f32.xlu0 %v790_v29  ;;  %752 = vadd.xlane.f32.xlu1 %v751_v42  ;;  %v829_v29 = vsel %vm714_vm2, %v688_v14, 0.0  ;;  %v6408_v42 = vld [vmem:[#allocation11_spill] sm:$0xff] }
 0x46f   :  { %v703_v20 = vmul.f32 %v6408_v42, %v5230_v59 }
 0x472   :  { %797 = vadd.xlane.f32.xlu0 %v796_v23  ;;  %758 = vadd.xlane.f32.xlu1 %v757_v58  ;;  %v690_v23 = vmul.f32 %v6409_v17, %v5230_v59  ;;  %v874_v58 = vsel %vm714_vm2, %v703_v20, 0.0 }
 0x474   :  { %v835_v57 = vsel %vm714_vm2, %v690_v23, 0.0 }
 0x476   :  { %803 = vadd.xlane.f32.xlu0 %v802_v63  ;;  %764 = vadd.xlane.f32.xlu1 %v763_v28  ;;  %v705_v63 = vmul.f32 %v6410_v26, %v5230_v59  ;;  %v6411_v28 = vld [vmem:[#allocation16_spill] sm:$0xff] }
 0x477   :  { %v692_v60 = vmul.f32 %v6411_v28, %v5230_v59 }
 0x478   :  { %v880_v61 = vsel %vm714_vm2, %v705_v63, 0.0 }
 0x47a   :  { %809 = vadd.xlane.f32.xlu0 %v808_v46  ;;  %770 = vadd.xlane.f32.xlu1 %v769_v11  ;;  %v841_v46 = vsel %vm714_vm2, %v692_v60, 0.0  ;;  %v6412_v11 = vld [vmem:[#allocation15_spill] sm:$0xff] }
 0x47b   :  { %v707_v0 = vmul.f32 %v6412_v11, %v5230_v59 }
 0x47e   :  { %776 = vadd.xlane.f32.xlu1 %v775_v32  ;;  %815 = vadd.xlane.f32.xlu0 %v814_v34  ;;  %v694_v32 = vmul.f32 %v6413_v39, %v5230_v59  ;;  %v886_v34 = vsel %vm714_vm2, %v707_v0, 0.0 }
 0x480   :  { %v847_v12 = vsel %vm714_vm2, %v694_v32, 0.0 }
 0x482   :  { %782 = vadd.xlane.f32.xlu1 %v781_v38  ;;  %821 = vadd.xlane.f32.xlu0 %v820_v24  ;;  %v709_v38 = vmul.f32 %v6414_v52, %v5230_v59  ;;  %v6415_v24 = vld [vmem:[#allocation21_spill] sm:$0xff] }
 0x483   :  { %v696_v9 = vmul.f32 %v6415_v24, %v5230_v59 }
 0x486   :  { %788 = vadd.xlane.f32.xlu1 %v787_v3  ;;  %827 = vadd.xlane.f32.xlu0 %v826_v36  ;;  %v892_v3 = vsel %vm714_vm2, %v709_v38, 0.0  ;;  %v853_v36 = vsel %vm714_vm2, %v696_v9, 0.0 }
 0x48a   :  { %794 = vadd.xlane.f32.xlu1 %v5215_v22  ;;  %833 = vadd.xlane.f32.xlu0 %v832_v43  ;;  %v811_v22 = vsel %vm714_vm2, %v682_v47, 0.0  ;;  %v711_v43 = vmul.f32 %v6416_v21, %v5230_v59  ;;  %v904_v47 = vsel %vm714_vm2, %v713_v35, 0.0 }
 0x48c   :  { %v898_v50 = vsel %vm714_vm2, %v711_v43, 0.0 }
 0x48e   :  { %800 = vadd.xlane.f32.xlu1 %v5218_v7  ;;  %839 = vadd.xlane.f32.xlu0 %v838_v33  ;;  %v6403_v7 = vld [vmem:[#allocation8_spill] sm:$0xff] }
 0x48f   :  { %v684_v45 = vmul.f32 %v6403_v7, %v5230_v59  ;;  %v600_v33 = vld [vmem:[%s6357_s0 + $0x190] sm:$0xff]  ;;  %v4652_v7 = vmov 1414812756   ;;  %s4655_s0 = smov [#allocation3]  }
 0x490   :  { %v700_v41 = vmul.f32 %v5230_v59, %v600_v33  ;;  %s4407_s19 = sshll.u32 %s4655_s0, 4  ;;  %s4408_s19 = int_to_ptr.vmem [resolvable:$true] %s4407_s19 }
 0x491   :  { %v817_v56 = vsel %vm714_vm2, %v684_v45, 0.0  ;;  %v986_v45 = vunpack.c.l.s4 %v4652_v7  ;;  %s4625_s20 = scalar_lea.vmem %s4408_s19, 64  ;;  %p4630_p1 = scmp.lt.s32.totalorder %s4408_s19, %s4408_s19 }
 0x492   :  { %806 = vadd.xlane.f32.xlu1 %v5221_v5  ;;  %845 = vadd.xlane.f32.xlu0 %v844_v48  ;;  %v699_v5 = vmul.f32 %v6404_v30, %v5230_v59  ;;  %v859_v48 = vsel %vm714_vm2, %v698_v31, 0.0  ;;  %v979_v59 = vunpack.c.l.s4 %v4651_v18  ;;  %p4626_p0 = scmp.ne.s32.totalorder %s4408_s19, %s4625_s20  ;;  %p4631_p2 = scmp.lt.s32.totalorder %s4625_s20, %s4625_s20 }
 0x493   :  { %v987_v54 = vunpack.c.0.s8 %v986_v45 }
 0x494   :  { %v862_v2 = vsel %vm714_vm2, %v699_v5, 0.0  ;;  %v980_v5 = vunpack.c.0.s8 %v979_v59  ;;  %p4632_p3 = por %p4631_p2, %p4630_p1 }
 0x496   :  { %851 = vadd.xlane.f32.xlu0 %v850_v1  ;;  %812 = vadd.xlane.f32.xlu1 %v811_v22  ;;  %v865_v1 = vsel %vm714_vm2, %v700_v41, 0.0  ;;  %v4650_v22 = vmov 269488144   ;;  %v5404_v8 = vsub.s32 %v980_v5, %v5150_v19  ;;  %vm4150_vm2 = vcmask 1048512   ;;  %p4633_p4 = pnand %p4632_p3, %p4626_p0 }
 0x497   :  { %v972_v44 = vunpack.c.l.s4 %v4650_v22 }
 0x499   :  { %v973_v30 = vunpack.c.0.s8 %v972_v44 }
 0x49a   :  { %857 = vadd.xlane.f32.xlu0 %v856_v10  ;;  %818 = vadd.xlane.f32.xlu1 %v817_v56  ;;  %v4653_v10 = vmov 1987475062  }
 0x49b   :  { %v993_v56 = vunpack.c.l.s4 %v4653_v10 }
 0x49e   :  { %863 = vadd.xlane.f32.xlu0 %v862_v2  ;;  %824 = vadd.xlane.f32.xlu1 %v823_v6  ;;  %v5407_v2 = vsub.s32 %v987_v54, %v5150_v19 }
 0x4a2   :  { %869 = vadd.xlane.f32.xlu0 %v868_v15  ;;  %830 = vadd.xlane.f32.xlu1 %v829_v29 }
 0x4a6   :  { %875 = vadd.xlane.f32.xlu0 %v874_v58  ;;  %836 = vadd.xlane.f32.xlu1 %v835_v57 }
 0x4aa   :  { %881 = vadd.xlane.f32.xlu0 %v880_v61  ;;  %842 = vadd.xlane.f32.xlu1 %v841_v46 }
 0x4ae   :  { %887 = vadd.xlane.f32.xlu0 %v886_v34  ;;  %848 = vadd.xlane.f32.xlu1 %v847_v12 }
 0x4b2   :  { %893 = vadd.xlane.f32.xlu0 %v892_v3  ;;  %854 = vadd.xlane.f32.xlu1 %v853_v36 }
 0x4b6   :  { %899 = vadd.xlane.f32.xlu0 %v898_v50  ;;  %860 = vadd.xlane.f32.xlu1 %v859_v48 }
 0x4ba   :  { %905 = vadd.xlane.f32.xlu0 %v904_v47  ;;  %866 = vadd.xlane.f32.xlu1 %v865_v1 }
 0x4be   :  { %872 = vadd.xlane.f32.xlu1 %v5255_v25  ;;  %v994_v25 = vunpack.c.0.s8 %v993_v56 }
 0x4c0   :  { %v5410_v6 = vsub.s32 %v994_v25, %v5150_v19 }
 0x4c2   :  { %878 = vadd.xlane.f32.xlu1 %v5260_v53  ;;  %v4654_v53 = vmov 1983009808  }
 0x4c6   :  { %884 = vadd.xlane.f32.xlu1 %v5263_v13  ;;  %v2766_v13 = vunpack.c.l.s4 %v4654_v53 }
 0x4ca   :  { %890 = vadd.xlane.f32.xlu1 %v5266_v55  ;;  %v5401_v55 = vsub.s32 %v973_v30, %v5150_v19 }
 0x4ce   :  { %896 = vadd.xlane.f32.xlu1 %v5269_v40  ;;  %v2767_v40 = vunpack.c.0.s8 %v2766_v13 }
 0x4d0   :  { %v5421_v23 = vsub.s32 %v2767_v40, %v5150_v19 }
 0x4d2   :  { %902 = vadd.xlane.f32.xlu1 %v5272_v16 }
 0x4d7   :  { %v717_v37 = vpop.xlane.xlu1 %716  ;;  %v720_v62 = vpop.xlane.xlu0 %719 }
 0x4d8   :  { %v977_v51 = vrot.slane %v717_v37, %v5401_v55  ;;  %v984_v16 = vrot.slane %v717_v37, %v5404_v8  ;;  %v991_v14 = vrot.slane %v717_v37, %v5407_v2  ;;  %v998_v15 = vrot.slane %v717_v37, %v5410_v6 }
 0x4d9   :  { %v1005_v29 = vrot.slane %v720_v62, %v5401_v55  ;;  %v1012_v42 = vrot.slane %v720_v62, %v5404_v8  ;;  %v1019_v20 = vrot.slane %v720_v62, %v5407_v2  ;;  %v1026_v17 = vrot.slane %v720_v62, %v5410_v6 }
 0x4da   :  { %v2763_v28 = vcombine.low %v977_v51, %v984_v16  ;;  %v2764_v60 = vcombine.low %v991_v14, %v998_v15 }
 0x4db   :  { %v723_v58 = vpop.xlane.xlu1 %722  ;;  %v5423_v57 = vpop.xlane.xlu0 %743  ;;  %v2780_v26 = vcombine.low %v1005_v29, %v1012_v42  ;;  %v2781_v63 = vcombine.low %v1019_v20, %v1026_v17 }
 0x4dc   :  { %v1033_v61 = vrot.slane %v723_v58, %v5401_v55  ;;  %v1040_v46 = vrot.slane %v723_v58, %v5404_v8  ;;  %v1047_v11 = vrot.slane %v723_v58, %v5407_v2  ;;  %v1054_v0 = vrot.slane %v723_v58, %v5410_v6 }
 0x4dd   :  { %v2788_v39 = vrot.slane %v2780_v26, %v5421_v23  ;;  %v2795_v32 = vrot.slane %v2781_v63, %v5421_v23  ;;  %v2771_v52 = vrot.slane %v2763_v28, %v5421_v23  ;;  %v2778_v38 = vrot.slane %v2764_v60, %v5421_v23 }
 0x4de   :  { %v2797_v24 = vcombine.low %v1033_v61, %v1040_v46  ;;  %v2798_v9 = vcombine.low %v1047_v11, %v1054_v0  ;;  %v1229_v13 = vrot.slane %v5423_v57, %v5401_v55  ;;  %v1236_v40 = vrot.slane %v5423_v57, %v5404_v8 }
 0x4df   :  { %v726_v34 = vpop.xlane.xlu1 %725  ;;  %v5431_v12 = vpop.xlane.xlu0 %749  ;;  %v2796_v43 = vcombine.low %v2788_v39, %v2795_v32  ;;  %v2779_v48 = vcombine.low %v2771_v52, %v2778_v38  ;;  %v1243_v37 = vrot.slane %v5423_v57, %v5407_v2  ;;  %v1250_v62 = vrot.slane %v5423_v57, %v5410_v6 }
 0x4e0   :  { %v1061_v49 = vrot.slane %v726_v34, %v5401_v55  ;;  %v1068_v3 = vrot.slane %v726_v34, %v5404_v8  ;;  %v1075_v36 = vrot.slane %v726_v34, %v5407_v2  ;;  %v1082_v21 = vrot.slane %v726_v34, %v5410_v6 }
 0x4e1   :  { %v2805_v31 = vrot.slane %v2797_v24, %v5421_v23  ;;  %v2812_v33 = vrot.slane %v2798_v9, %v5421_v23  ;;  %3855 = vperm.xlu0 %4562, %v2796_v43   ;;  %v2916_v57 = vcombine.low %v1229_v13, %v1236_v40  ;;  %v2917_v28 = vcombine.low %v1243_v37, %v1250_v62 }
 0x4e2   :  { %v2814_v35 = vcombine.low %v1061_v49, %v1068_v3  ;;  %v2815_v41 = vcombine.low %v1075_v36, %v1082_v21  ;;  %v1285_v11 = vrot.slane %v5431_v12, %v5401_v55  ;;  %v1292_v0 = vrot.slane %v5431_v12, %v5404_v8 }
 0x4e3   :  { %v729_v50 = vpop.xlane.xlu1 %728  ;;  %v5441_v27 = vpop.xlane.xlu0 %755  ;;  %3852 = vperm.xlu1 %4561, %v2779_v48   ;;  %v2813_v18 = vcombine.low %v2805_v31, %v2812_v33  ;;  %v1299_v3 = vrot.slane %v5431_v12, %v5407_v2  ;;  %v1306_v36 = vrot.slane %v5431_v12, %v5410_v6  ;;  %v2924_v21 = vrot.slane %v2916_v57, %v5421_v23 }
 0x4e4   :  { %v1089_v47 = vrot.slane %v729_v50, %v5401_v55  ;;  %v1096_v1 = vrot.slane %v729_v50, %v5404_v8  ;;  %v1103_v22 = vrot.slane %v729_v50, %v5407_v2  ;;  %v1110_v44 = vrot.slane %v729_v50, %v5410_v6 }
 0x4e5   :  { %v2822_v45 = vrot.slane %v2814_v35, %v5421_v23  ;;  %v2829_v10 = vrot.slane %v2815_v41, %v5421_v23  ;;  %v2931_v43 = vrot.slane %v2917_v28, %v5421_v23  ;;  %v1341_v35 = vrot.slane %v5441_v27, %v5401_v55 }
 0x4e6   :  { %v2831_v56 = vcombine.low %v1089_v47, %v1096_v1  ;;  %v2832_v30 = vcombine.low %v1103_v22, %v1110_v44  ;;  %v1348_v41 = vrot.slane %v5441_v27, %v5404_v8  ;;  %v1355_v12 = vrot.slane %v5441_v27, %v5407_v2 }
 0x4e7   :  { %v732_v59 = vpop.xlane.xlu1 %731  ;;  %v5447_v7 = vpop.xlane.xlu0 %761  ;;  %3858 = vperm.xlu1 %4561, %v2813_v18   ;;  %v2830_v14 = vcombine.low %v2822_v45, %v2829_v10  ;;  %v1362_v10 = vrot.slane %v5441_v27, %v5410_v6 }
 0x4e8   :  { %v1117_v5 = vrot.slane %v732_v59, %v5401_v55  ;;  %v1124_v54 = vrot.slane %v732_v59, %v5404_v8  ;;  %v1131_v25 = vrot.slane %v732_v59, %v5407_v2  ;;  %v1138_v53 = vrot.slane %v732_v59, %v5410_v6 }
 0x4e9   :  { %v2839_v29 = vrot.slane %v2831_v56, %v5421_v23  ;;  %v2846_v42 = vrot.slane %v2832_v30, %v5421_v23  ;;  %v2932_v56 = vcombine.low %v2924_v21, %v2931_v43  ;;  %v2950_v30 = vcombine.low %v1285_v11, %v1292_v0 }
 0x4ea   :  { %v2848_v51 = vcombine.low %v1117_v5, %v1124_v54  ;;  %v2849_v20 = vcombine.low %v1131_v25, %v1138_v53  ;;  %v2951_v5 = vcombine.low %v1299_v3, %v1306_v36  ;;  %v1397_v40 = vrot.slane %v5447_v7, %v5401_v55 }
 0x4eb   :  { %v735_v16 = vpop.xlane.xlu1 %734  ;;  %v5463_v15 = vpop.xlane.xlu0 %767  ;;  %3861 = vperm.xlu1 %4561, %v2830_v14   ;;  %v2847_v32 = vcombine.low %v2839_v29, %v2846_v42  ;;  %v1404_v37 = vrot.slane %v5447_v7, %v5404_v8  ;;  %v1411_v62 = vrot.slane %v5447_v7, %v5407_v2  ;;  %v2985_v36 = vcombine.low %v1355_v12, %v1362_v10 }
 0x4ec   :  { %v1145_v17 = vrot.slane %v735_v16, %v5401_v55  ;;  %v1152_v58 = vrot.slane %v735_v16, %v5404_v8  ;;  %v1159_v26 = vrot.slane %v735_v16, %v5407_v2  ;;  %v1166_v63 = vrot.slane %v735_v16, %v5410_v6 }
 0x4ed   :  { %v2856_v60 = vrot.slane %v2848_v51, %v5421_v23  ;;  %v2863_v61 = vrot.slane %v2849_v20, %v5421_v23  ;;  %v1460_v11 = vrot.slane %v5463_v15, %v5404_v8  ;;  %v3018_v10 = vcombine.low %v1397_v40, %v1404_v37 }
 0x4ee   :  { %v2865_v46 = vcombine.low %v1145_v17, %v1152_v58  ;;  %v2866_v52 = vcombine.low %v1159_v26, %v1166_v63  ;;  %v1418_v17 = vrot.slane %v5447_v7, %v5410_v6  ;;  %v2958_v58 = vrot.slane %v2950_v30, %v5421_v23 }
 0x4ef   :  { %v738_v39 = vpop.xlane.xlu1 %737  ;;  %v5477_v34 = vpop.xlane.xlu0 %773  ;;  %3864 = vperm.xlu1 %4561, %v2847_v32   ;;  %v2864_v31 = vcombine.low %v2856_v60, %v2863_v61  ;;  %v2965_v26 = vrot.slane %v2951_v5, %v5421_v23  ;;  %v2984_v63 = vcombine.low %v1341_v35, %v1348_v41  ;;  %v1467_v7 = vrot.slane %v5463_v15, %v5407_v2 }
 0x4f0   :  { %v1173_v38 = vrot.slane %v738_v39, %v5401_v55  ;;  %v1180_v24 = vrot.slane %v738_v39, %v5404_v8  ;;  %v1187_v9 = vrot.slane %v738_v39, %v5407_v2  ;;  %v1194_v49 = vrot.slane %v738_v39, %v5410_v6 }
 0x4f1   :  { %v2873_v33 = vrot.slane %v2865_v46, %v5421_v23  ;;  %v2880_v50 = vrot.slane %v2866_v52, %v5421_v23  ;;  %3867 = vperm.xlu0 %4562, %v2864_v31   ;;  %v1453_v46 = vrot.slane %v5463_v15, %v5401_v55  ;;  %v2966_v3 = vcombine.low %v2958_v58, %v2965_v26 }
 0x4f2   :  { %v2882_v48 = vcombine.low %v1173_v38, %v1180_v24  ;;  %v2883_v22 = vcombine.low %v1187_v9, %v1194_v49  ;;  %v1474_v49 = vrot.slane %v5463_v15, %v5410_v6  ;;  %v2992_v21 = vrot.slane %v2984_v63, %v5421_v23 }
 0x4f3   :  { %v741_v47 = vpop.xlane.xlu1 %740  ;;  %v5497_v1 = vpop.xlane.xlu0 %779  ;;  %v2881_v54 = vcombine.low %v2873_v33, %v2880_v50  ;;  %v1516_v35 = vrot.slane %v5477_v34, %v5404_v8  ;;  %v1523_v41 = vrot.slane %v5477_v34, %v5407_v2  ;;  %v3019_v30 = vcombine.low %v1411_v62, %v1418_v17 }
 0x4f4   :  { %v1201_v44 = vrot.slane %v741_v47, %v5401_v55  ;;  %v1208_v18 = vrot.slane %v741_v47, %v5404_v8  ;;  %v1215_v59 = vrot.slane %v741_v47, %v5407_v2  ;;  %v1222_v45 = vrot.slane %v741_v47, %v5410_v6 }
 0x4f5   :  { %v2890_v25 = vrot.slane %v2882_v48, %v5421_v23  ;;  %v2897_v53 = vrot.slane %v2883_v22, %v5421_v23  ;;  %3870 = vperm.xlu1 %4561, %v2881_v54   ;;  %v1509_v48 = vrot.slane %v5477_v34, %v5401_v55  ;;  %v1530_v5 = vrot.slane %v5477_v34, %v5410_v6 }
 0x4f6   :  { %v2899_v13 = vcombine.low %v1201_v44, %v1208_v18  ;;  %v2900_v16 = vcombine.low %v1215_v59, %v1222_v45  ;;  %v2999_v45 = vrot.slane %v2985_v36, %v5421_v23  ;;  %v3026_v17 = vrot.slane %v3018_v10, %v5421_v23 }
 0x4f7   :  { %v747_v51 = vpop.xlane.xlu1 %746  ;;  %v5513_v27 = vpop.xlane.xlu0 %785  ;;  %v2898_v57 = vcombine.low %v2890_v25, %v2897_v53  ;;  %v1565_v53 = vrot.slane %v5497_v1, %v5401_v55  ;;  %v3033_v58 = vrot.slane %v3019_v30, %v5421_v23 }
 0x4f8   :  { %v1257_v14 = vrot.slane %v747_v51, %v5401_v55  ;;  %v1264_v29 = vrot.slane %v747_v51, %v5404_v8  ;;  %v1271_v42 = vrot.slane %v747_v51, %v5407_v2  ;;  %v1278_v20 = vrot.slane %v747_v51, %v5410_v6 }
 0x4f9   :  { %v2907_v28 = vrot.slane %v2899_v13, %v5421_v23  ;;  %v2914_v60 = vrot.slane %v2900_v16, %v5421_v23  ;;  %3873 = vperm.xlu0 %4562, %v2898_v57   ;;  %v1572_v13 = vrot.slane %v5497_v1, %v5404_v8  ;;  %v3052_v57 = vcombine.low %v1453_v46, %v1460_v11 }
 0x4fa   :  { %v2933_v61 = vcombine.low %v1257_v14, %v1264_v29  ;;  %v2934_v32 = vcombine.low %v1271_v42, %v1278_v20  ;;  %v3000_v20 = vcombine.low %v2992_v21, %v2999_v45  ;;  %v1621_v11 = vrot.slane %v5513_v27, %v5401_v55 }
 0x4fb   :  { %v753_v0 = vpop.xlane.xlu1 %752  ;;  %v5531_v39 = vpop.xlane.xlu0 %791  ;;  %v2915_v43 = vcombine.low %v2907_v28, %v2914_v60  ;;  %v3053_v28 = vcombine.low %v1467_v7, %v1474_v49  ;;  %v1579_v60 = vrot.slane %v5497_v1, %v5407_v2  ;;  %v1628_v7 = vrot.slane %v5513_v27, %v5404_v8 }
 0x4fc   :  { %v1313_v52 = vrot.slane %v753_v0, %v5401_v55  ;;  %v1320_v38 = vrot.slane %v753_v0, %v5404_v8  ;;  %v1327_v24 = vrot.slane %v753_v0, %v5407_v2  ;;  %v1334_v9 = vrot.slane %v753_v0, %v5410_v6 }
 0x4fd   :  { %v2941_v31 = vrot.slane %v2933_v61, %v5421_v23  ;;  %v2948_v33 = vrot.slane %v2934_v32, %v5421_v23  ;;  %3876 = vperm.xlu1 %4561, %v2915_v43   ;;  %3879 = vperm.xlu0 %4562, %v2932_v56   ;;  %v3034_v21 = vcombine.low %v3026_v17, %v3033_v58 }
 0x4fe   :  { %v2967_v50 = vcombine.low %v1313_v52, %v1320_v38  ;;  %v2968_v12 = vcombine.low %v1327_v24, %v1334_v9  ;;  %v1586_v24 = vrot.slane %v5497_v1, %v5410_v6  ;;  %v3060_v43 = vrot.slane %v3052_v57, %v5421_v23 }
 0x4ff   :  { %v759_v15 = vpop.xlane.xlu1 %758  ;;  %v5548_v47 = vpop.xlane.xlu0 %797  ;;  %v2949_v54 = vcombine.low %v2941_v31, %v2948_v33  ;;  %v3067_v31 = vrot.slane %v3053_v28, %v5421_v23  ;;  %v1642_v10 = vrot.slane %v5513_v27, %v5410_v6  ;;  %v1677_v30 = vrot.slane %v5531_v39, %v5401_v55 }
 0x500   :  { %v1369_v22 = vrot.slane %v759_v15, %v5401_v55  ;;  %v1376_v44 = vrot.slane %v759_v15, %v5404_v8  ;;  %v1383_v18 = vrot.slane %v759_v15, %v5407_v2  ;;  %v1390_v59 = vrot.slane %v759_v15, %v5410_v6 }
 0x501   :  { %v2975_v25 = vrot.slane %v2967_v50, %v5421_v23  ;;  %v2982_v56 = vrot.slane %v2968_v12, %v5421_v23  ;;  %3882 = vperm.xlu1 %4561, %v2949_v54   ;;  %3885 = vperm.xlu0 %4562, %v2966_v3   ;;  %v1684_v54 = vrot.slane %v5531_v39, %v5404_v8 }
 0x502   :  { %v3001_v14 = vcombine.low %v1369_v22, %v1376_v44  ;;  %v3002_v40 = vcombine.low %v1383_v18, %v1390_v59  ;;  %v1635_v18 = vrot.slane %v5513_v27, %v5407_v2 }
 0x503   :  { %v765_v51 = vpop.xlane.xlu1 %764  ;;  %v5563_v16 = vpop.xlane.xlu0 %803  ;;  %v2983_v26 = vcombine.low %v2975_v25, %v2982_v56  ;;  %v3086_v25 = vcombine.low %v1509_v48, %v1516_v35  ;;  %v3087_v48 = vcombine.low %v1523_v41, %v1530_v5  ;;  %v1698_v35 = vrot.slane %v5531_v39, %v5410_v6 }
 0x504   :  { %v1425_v37 = vrot.slane %v765_v51, %v5401_v55  ;;  %v1432_v62 = vrot.slane %v765_v51, %v5404_v8  ;;  %v1439_v29 = vrot.slane %v765_v51, %v5407_v2  ;;  %v1446_v42 = vrot.slane %v765_v51, %v5410_v6 }
 0x505   :  { %v3009_v63 = vrot.slane %v3001_v14, %v5421_v23  ;;  %v3016_v38 = vrot.slane %v3002_v40, %v5421_v23  ;;  %3888 = vperm.xlu1 %4561, %v2983_v26   ;;  %3891 = vperm.xlu0 %4562, %v3000_v20   ;;  %v3068_v40 = vcombine.low %v3060_v43, %v3067_v31 }
 0x506   :  { %v3035_v61 = vcombine.low %v1425_v37, %v1432_v62  ;;  %v3036_v0 = vcombine.low %v1439_v29, %v1446_v42  ;;  %v1691_v37 = vrot.slane %v5531_v39, %v5407_v2  ;;  %v1789_v17 = vrot.slane %v5563_v16, %v5401_v55 }
 0x507   :  { %v771_v32 = vpop.xlane.xlu1 %770  ;;  %v5574_v52 = vpop.xlane.xlu0 %809  ;;  %v3017_v36 = vcombine.low %v3009_v63, %v3016_v38  ;;  %v1796_v26 = vrot.slane %v5563_v16, %v5404_v8  ;;  %v1803_v63 = vrot.slane %v5563_v16, %v5407_v2  ;;  %v1810_v57 = vrot.slane %v5563_v16, %v5410_v6 }
 0x508   :  { %v1481_v9 = vrot.slane %v771_v32, %v5401_v55  ;;  %v1488_v46 = vrot.slane %v771_v32, %v5404_v8  ;;  %v1495_v49 = vrot.slane %v771_v32, %v5407_v2  ;;  %v1502_v3 = vrot.slane %v771_v32, %v5410_v6 }
 0x509   :  { %v3043_v22 = vrot.slane %v3035_v61, %v5421_v23  ;;  %v3050_v44 = vrot.slane %v3036_v0, %v5421_v23  ;;  %3894 = vperm.xlu1 %4561, %v3017_v36   ;;  %3897 = vperm.xlu0 %4562, %v3034_v21   ;;  %v3094_v34 = vrot.slane %v3086_v25, %v5421_v23  ;;  %v6418_v61 = vld [vmem:[#allocation24_spill] sm:$0xff] }
 0x50a   :  { %v3069_v33 = vcombine.low %v1481_v9, %v1488_v46  ;;  %v3070_v50 = vcombine.low %v1495_v49, %v1502_v3  ;;  %v1733_v41 = vrot.slane %v5548_v47, %v5401_v55  ;;  %v5637_v0 = vadd.s32 4294967288, %v6418_v61 }
 0x50b   :  { %v777_v15 = vpop.xlane.xlu1 %776  ;;  %v5589_v12 = vpop.xlane.xlu0 %815  ;;  %v3051_v14 = vcombine.low %v3043_v22, %v3050_v44  ;;  %v1740_v32 = vrot.slane %v5548_v47, %v5404_v8  ;;  %v3101_v46 = vrot.slane %v3087_v48, %v5421_v23  ;;  %v1747_v3 = vrot.slane %v5548_v47, %v5407_v2 }
 0x50c   :  { %v1537_v59 = vrot.slane %v777_v15, %v5401_v55  ;;  %v1544_v45 = vrot.slane %v777_v15, %v5404_v8  ;;  %v1551_v56 = vrot.slane %v777_v15, %v5407_v2  ;;  %v1558_v51 = vrot.slane %v777_v15, %v5410_v6 }
 0x50d   :  { %v3077_v42 = vrot.slane %v3069_v33, %v5421_v23  ;;  %v3084_v20 = vrot.slane %v3070_v50, %v5421_v23  ;;  %3900 = vperm.xlu1 %4561, %v3051_v14   ;;  %3903 = vperm.xlu0 %4562, %v3068_v40   ;;  %v1754_v31 = vrot.slane %v5548_v47, %v5410_v6 }
 0x50e   :  { %v3103_v58 = vcombine.low %v1537_v59, %v1544_v45  ;;  %v3104_v5 = vcombine.low %v1551_v56, %v1558_v51  ;;  %v5653_v33 = vcombine.low %v1789_v17, %v1796_v26  ;;  %v5655_v50 = vcombine.low %v1803_v63, %v1810_v57 }
 0x50f   :  { %v783_v62 = vpop.xlane.xlu1 %782  ;;  %v5613_v29 = vpop.xlane.xlu0 %821  ;;  %v3085_v28 = vcombine.low %v3077_v42, %v3084_v20  ;;  %v3102_v15 = vcombine.low %v3094_v34, %v3101_v46  ;;  %v1845_v22 = vrot.slane %v5574_v52, %v5401_v55  ;;  %v1852_v44 = vrot.slane %v5574_v52, %v5404_v8 }
 0x510   :  { %v1593_v38 = vrot.slane %v783_v62, %v5401_v55  ;;  %v1600_v9 = vrot.slane %v783_v62, %v5404_v8  ;;  %v1607_v36 = vrot.slane %v783_v62, %v5407_v2  ;;  %v1614_v21 = vrot.slane %v783_v62, %v5410_v6 }
 0x511   :  { %3906 = vperm.xlu1 %4561, %v3085_v28   ;;  %v3111_v43 = vrot.slane %v3103_v58, %v5421_v23  ;;  %v3118_v59 = vrot.slane %v3104_v5, %v5421_v23  ;;  %v5663_v45 = vadd.s32 4294967280, %v6418_v61  ;;  %v1859_v25 = vrot.slane %v5574_v52, %v5407_v2  ;;  %3909 = vperm.xlu0 %4562, %v3102_v15  }
 0x512   :  { %v3137_v56 = vcombine.low %v1593_v38, %v1600_v9  ;;  %v3120_v51 = vcombine.low %v1565_v53, %v1572_v13  ;;  %v3121_v14 = vcombine.low %v1579_v60, %v1586_v24  ;;  %v3138_v42 = vcombine.low %v1607_v36, %v1614_v21 }
 0x513   :  { %v789_v16 = vpop.xlane.xlu1 %788  ;;  %v5644_v49 = vpop.xlane.xlu0 %827  ;;  %v3119_v17 = vcombine.low %v3111_v43, %v3118_v59  ;;  %v1866_v1 = vrot.slane %v5574_v52, %v5410_v6  ;;  %v5689_v60 = vcombine.low %v1845_v22, %v1852_v44  ;;  %v1901_v24 = vrot.slane %v5589_v12, %v5401_v55 }
 0x514   :  { %v1649_v20 = vrot.slane %v789_v16, %v5401_v55  ;;  %v1656_v48 = vrot.slane %v789_v16, %v5404_v8  ;;  %v1663_v58 = vrot.slane %v789_v16, %v5407_v2  ;;  %v1670_v53 = vrot.slane %v789_v16, %v5410_v6 }
 0x515   :  { %v3128_v13 = vrot.slane %v3120_v51, %v5421_v23  ;;  %v3135_v26 = vrot.slane %v3121_v14, %v5421_v23  ;;  %v1908_v63 = vrot.slane %v5589_v12, %v5404_v8  ;;  %3912 = vperm.xlu1 %4561, %v3119_v17   ;;  %v1915_v57 = vrot.slane %v5589_v12, %v5407_v2 }
 0x516   :  { %v1922_v34 = vrot.slane %v5589_v12, %v5410_v6  ;;  %v3145_v28 = vrot.slane %v3137_v56, %v5421_v23  ;;  %v3171_v9 = vcombine.low %v1649_v20, %v1656_v48  ;;  %v3152_v46 = vrot.slane %v3138_v42, %v5421_v23 }
 0x517   :  { %v795_v40 = vpop.xlane.xlu1 %794  ;;  %v5679_v62 = vpop.xlane.xlu0 %833  ;;  %v3136_v5 = vcombine.low %v3128_v13, %v3135_v26  ;;  %v3154_v16 = vcombine.low %v1621_v11, %v1628_v7  ;;  %v3155_v12 = vcombine.low %v1635_v18, %v1642_v10  ;;  %v3172_v36 = vcombine.low %v1663_v58, %v1670_v53 }
 0x518   :  { %v1705_v21 = vrot.slane %v795_v40, %v5401_v55  ;;  %v1712_v43 = vrot.slane %v795_v40, %v5404_v8  ;;  %v1719_v15 = vrot.slane %v795_v40, %v5407_v2  ;;  %v1726_v22 = vrot.slane %v795_v40, %v5410_v6 }
 0x519   :  { %3915 = vperm.xlu0 %4562, %v3136_v5   ;;  %v3153_v44 = vcombine.low %v3145_v28, %v3152_v46  ;;  %v3162_v11 = vrot.slane %v3154_v16, %v5421_v23  ;;  %v3169_v7 = vrot.slane %v3155_v12, %v5421_v23  ;;  %v5721_v59 = vcombine.low %v1859_v25, %v1866_v1 }
 0x51a   :  { %v5723_v56 = vcombine.low %v1901_v24, %v1908_v63  ;;  %v1957_v27 = vrot.slane %v5613_v29, %v5401_v55  ;;  %v1964_v18 = vrot.slane %v5613_v29, %v5404_v8  ;;  %v3179_v42 = vrot.slane %v3171_v9, %v5421_v23 }
 0x51b   :  { %v801_v38 = vpop.xlane.xlu1 %800  ;;  %v5700_v52 = vpop.xlane.xlu0 %839  ;;  %3918 = vperm.xlu1 %4561, %v3153_v44   ;;  %v3170_v51 = vcombine.low %v3162_v11, %v3169_v7  ;;  %v3205_v25 = vcombine.low %v1705_v21, %v1712_v43  ;;  %v3186_v48 = vrot.slane %v3172_v36, %v5421_v23  ;;  %v3188_v17 = vcombine.low %v1677_v30, %v1684_v54 }
 0x51c   :  { %v1761_v14 = vrot.slane %v801_v38, %v5401_v55  ;;  %v1768_v40 = vrot.slane %v801_v38, %v5404_v8  ;;  %v3189_v58 = vcombine.low %v1691_v37, %v1698_v35  ;;  %v5747_v53 = vcombine.low %v1915_v57, %v1922_v34 }
 0x51d   :  { %v1971_v13 = vrot.slane %v5613_v29, %v5407_v2  ;;  %v3206_v26 = vcombine.low %v1719_v15, %v1726_v22  ;;  %3921 = vperm.xlu0 %4562, %v3170_v51   ;;  %v1775_v1 = vrot.slane %v801_v38, %v5407_v2  ;;  %v1782_v24 = vrot.slane %v801_v38, %v5410_v6 }
 0x51e   :  { %v3187_v63 = vcombine.low %v3179_v42, %v3186_v48  ;;  %v3196_v30 = vrot.slane %v3188_v17, %v5421_v23  ;;  %v3203_v54 = vrot.slane %v3189_v58, %v5421_v23  ;;  %v1978_v39 = vrot.slane %v5613_v29, %v5410_v6 }
 0x51f   :  { %v807_v10 = vpop.xlane.xlu1 %806  ;;  %v5732_v20 = vpop.xlane.xlu0 %845  ;;  %v5757_v37 = vcombine.low %v1957_v27, %v1964_v18  ;;  %v3239_v35 = vcombine.low %v1761_v14, %v1768_v40  ;;  %v3213_v9 = vrot.slane %v3205_v25, %v5421_v23  ;;  %v3220_v16 = vrot.slane %v3206_v26, %v5421_v23 }
 0x520   :  { %v1817_v57 = vrot.slane %v807_v10, %v5401_v55  ;;  %3924 = vperm.xlu1 %4561, %v3187_v63   ;;  %v3204_v34 = vcombine.low %v3196_v30, %v3203_v54  ;;  %v1824_v28 = vrot.slane %v807_v10, %v5404_v8  ;;  %v1831_v38 = vrot.slane %v807_v10, %v5407_v2 }
 0x521   :  { %v1838_v46 = vrot.slane %v807_v10, %v5410_v6  ;;  %v3222_v29 = vcombine.low %v1733_v41, %v1740_v32  ;;  %v3223_v12 = vcombine.low %v1747_v3, %v1754_v31  ;;  %v2013_v21 = vrot.slane %v5644_v49, %v5401_v55 }
 0x522   :  { %v2020_v43 = vrot.slane %v5644_v49, %v5404_v8  ;;  %v2027_v15 = vrot.slane %v5644_v49, %v5407_v2  ;;  %v3240_v22 = vcombine.low %v1775_v1, %v1782_v24  ;;  %3927 = vperm.xlu0 %4562, %v3204_v34   ;;  %v2034_v32 = vrot.slane %v5644_v49, %v5410_v6 }
 0x523   :  { %v813_v5 = vpop.xlane.xlu1 %812  ;;  %v5777_v36 = vpop.xlane.xlu0 %851  ;;  %v3221_v44 = vcombine.low %v3213_v9, %v3220_v16  ;;  %v3230_v47 = vrot.slane %v3222_v29, %v5421_v23  ;;  %v3237_v3 = vrot.slane %v3223_v12, %v5421_v23  ;;  %v5789_v31 = vcombine.low %v1971_v13, %v1978_v39 }
 0x524   :  { %v2069_v11 = vrot.slane %v5679_v62, %v5401_v55  ;;  %v2076_v7 = vrot.slane %v5679_v62, %v5404_v8  ;;  %v3273_v27 = vcombine.low %v1817_v57, %v1824_v28  ;;  %v3274_v18 = vcombine.low %v1831_v38, %v1838_v46 }
 0x525   :  { %3930 = vperm.xlu1 %4561, %v3221_v44   ;;  %v3238_v10 = vcombine.low %v3230_v47, %v3237_v3  ;;  %v1873_v51 = vrot.slane %v813_v5, %v5401_v55  ;;  %v3247_v49 = vrot.slane %v3239_v35, %v5421_v23  ;;  %v1880_v14 = vrot.slane %v813_v5, %v5404_v8 }
 0x526   :  { %v3254_v40 = vrot.slane %v3240_v22, %v5421_v23  ;;  %v3264_v42 = vrot.slane %v5653_v33, %v5421_v23  ;;  %v3271_v25 = vrot.slane %v5655_v50, %v5421_v23  ;;  %v5803_v17 = vcombine.low %v2013_v21, %v2020_v43 }
 0x527   :  { %v819_v41 = vpop.xlane.xlu1 %818  ;;  %v5805_v58 = vcombine.low %v2027_v15, %v2034_v32  ;;  %3933 = vperm.xlu0 %4562, %v3238_v10   ;;  %v1887_v13 = vrot.slane %v813_v5, %v5407_v2  ;;  %v1894_v26 = vrot.slane %v813_v5, %v5410_v6  ;;  %v5809_v1 = vpop.xlane.xlu0 %857  ;;  %v2083_v24 = vrot.slane %v5679_v62, %v5407_v2 }
 0x528   :  { %v2090_v33 = vrot.slane %v5679_v62, %v5410_v6  ;;  %v5815_v63 = vcombine.low %v2069_v11, %v2076_v7  ;;  %v3255_v50 = vcombine.low %v3247_v49, %v3254_v40  ;;  %v2125_v30 = vrot.slane %v5700_v52, %v5401_v55 }
 0x529   :  { %v3272_v54 = vcombine.low %v3264_v42, %v3271_v25  ;;  %v1929_v39 = vrot.slane %v819_v41, %v5401_v55  ;;  %v1936_v35 = vrot.slane %v819_v41, %v5404_v8  ;;  %v3307_v5 = vcombine.low %v1873_v51, %v1880_v14 }
 0x52a   :  { %3936 = vperm.xlu1 %4561, %v3255_v50   ;;  %v3281_v57 = vrot.slane %v3273_v27, %v5421_v23  ;;  %v3288_v34 = vrot.slane %v3274_v18, %v5421_v23  ;;  %v3298_v62 = vrot.slane %v5689_v60, %v5421_v23  ;;  %v3308_v38 = vcombine.low %v1887_v13, %v1894_v26 }
 0x52b   :  { %v825_v48 = vpop.xlane.xlu1 %824  ;;  %3939 = vperm.xlu0 %4562, %v3272_v54   ;;  %v1943_v9 = vrot.slane %v819_v41, %v5407_v2  ;;  %v1950_v46 = vrot.slane %v819_v41, %v5410_v6  ;;  %v3305_v16 = vrot.slane %v5721_v59, %v5421_v23  ;;  %v2132_v29 = vrot.slane %v5700_v52, %v5404_v8  ;;  %v5840_v41 = vpop.xlane.xlu0 %863 }
 0x52c   :  { %v2139_v12 = vrot.slane %v5700_v52, %v5407_v2  ;;  %v2146_v60 = vrot.slane %v5700_v52, %v5410_v6  ;;  %v3289_v21 = vcombine.low %v3281_v57, %v3288_v34  ;;  %v5837_v43 = vcombine.low %v2083_v24, %v2090_v33 }
 0x52d   :  { %v3341_v15 = vcombine.low %v1929_v39, %v1936_v35  ;;  %v3306_v22 = vcombine.low %v3298_v62, %v3305_v16  ;;  %v1985_v32 = vrot.slane %v825_v48, %v5401_v55  ;;  %v1992_v59 = vrot.slane %v825_v48, %v5404_v8 }
 0x52e   :  { %3942 = vperm.xlu1 %4561, %v3289_v21   ;;  %v1999_v44 = vrot.slane %v825_v48, %v5407_v2  ;;  %v2006_v47 = vrot.slane %v825_v48, %v5410_v6  ;;  %v3315_v3 = vrot.slane %v3307_v5, %v5421_v23  ;;  %v3342_v52 = vcombine.low %v1943_v9, %v1950_v46 }
 0x52f   :  { %v5825_v28 = vpop.xlane.xlu1 %830  ;;  %3945 = vperm.xlu0 %4562, %v3306_v22   ;;  %v3322_v7 = vrot.slane %v3308_v38, %v5421_v23  ;;  %v3332_v27 = vrot.slane %v5723_v56, %v5421_v23  ;;  %v3339_v18 = vrot.slane %v5747_v53, %v5421_v23  ;;  %v5851_v10 = vcombine.low %v2125_v30, %v2132_v29  ;;  %v5871_v50 = vpop.xlane.xlu0 %869 }
 0x530   :  { %v5853_v51 = vcombine.low %v2139_v12, %v2146_v60  ;;  %v2181_v49 = vrot.slane %v5732_v20, %v5401_v55  ;;  %v2188_v14 = vrot.slane %v5732_v20, %v5404_v8  ;;  %v2195_v40 = vrot.slane %v5732_v20, %v5407_v2 }
 0x531   :  { %v2202_v42 = vrot.slane %v5732_v20, %v5410_v6  ;;  %v3323_v56 = vcombine.low %v3315_v3, %v3322_v7  ;;  %v3340_v25 = vcombine.low %v3332_v27, %v3339_v18  ;;  %v2237_v53 = vrot.slane %v5777_v36, %v5401_v55 }
 0x532   :  { %v3375_v48 = vcombine.low %v1985_v32, %v1992_v59  ;;  %v3376_v13 = vcombine.low %v1999_v44, %v2006_v47  ;;  %v2041_v26 = vrot.slane %v5825_v28, %v5401_v55  ;;  %v2048_v33 = vrot.slane %v5825_v28, %v5404_v8 }
 0x533   :  { %v837_v11 = vpop.xlane.xlu1 %836  ;;  %3948 = vperm.xlu1 %4561, %v3323_v56   ;;  %3951 = vperm.xlu0 %4562, %v3340_v25   ;;  %v3349_v20 = vrot.slane %v3341_v15, %v5421_v23  ;;  %v3356_v30 = vrot.slane %v3342_v52, %v5421_v23  ;;  %v5876_v54 = vadd.s32 4294967272, %v6418_v61  ;;  %v2055_v39 = vrot.slane %v5825_v28, %v5407_v2  ;;  %v876_v3 = vpop.xlane.xlu0 %875 }
 0x534   :  { %v2062_v35 = vrot.slane %v5825_v28, %v5410_v6  ;;  %v3366_v5 = vrot.slane %v5757_v37, %v5421_v23  ;;  %v3373_v57 = vrot.slane %v5789_v31, %v5421_v23  ;;  %v2244_v34 = vrot.slane %v5777_v36, %v5404_v8 }
 0x535   :  { %v2251_v62 = vrot.slane %v5777_v36, %v5407_v2  ;;  %v2258_v38 = vrot.slane %v5777_v36, %v5410_v6  ;;  %v3357_v9 = vcombine.low %v3349_v20, %v3356_v30  ;;  %v5892_v46 = vcombine.low %v2181_v49, %v2188_v14 }
 0x536   :  { %v5894_v16 = vcombine.low %v2195_v40, %v2202_v42  ;;  %v3374_v28 = vcombine.low %v3366_v5, %v3373_v57  ;;  %v2097_v37 = vrot.slane %v837_v11, %v5401_v55  ;;  %v2104_v31 = vrot.slane %v837_v11, %v5404_v8 }
 0x537   :  { %v5867_v24 = vpop.xlane.xlu1 %842  ;;  %3954 = vperm.xlu1 %4561, %v3357_v9   ;;  %v2111_v12 = vrot.slane %v837_v11, %v5407_v2  ;;  %v2118_v60 = vrot.slane %v837_v11, %v5410_v6  ;;  %v3383_v21 = vrot.slane %v3375_v48, %v5421_v23  ;;  %v3409_v36 = vcombine.low %v2041_v26, %v2048_v33 }
 0x538   :  { %v3410_v15 = vcombine.low %v2055_v39, %v2062_v35  ;;  %3957 = vperm.xlu0 %4562, %v3374_v28   ;;  %v3390_v22 = vrot.slane %v3376_v13, %v5421_v23  ;;  %v3400_v32 = vrot.slane %v5803_v17, %v5421_v23  ;;  %v5906_v59 = vcombine.low %v2237_v53, %v2244_v34 }
 0x539   :  { %v5908_v44 = vcombine.low %v2251_v62, %v2258_v38  ;;  %v2293_v47 = vrot.slane %v5809_v1, %v5401_v55  ;;  %v3407_v11 = vrot.slane %v5805_v58, %v5421_v23  ;;  %v2300_v52 = vrot.slane %v5809_v1, %v5404_v8 }
 0x53a   :  { %v2349_v7 = vrot.slane %v5840_v41, %v5401_v55  ;;  %v2356_v17 = vrot.slane %v5840_v41, %v5404_v8  ;;  %v3391_v27 = vcombine.low %v3383_v21, %v3390_v22  ;;  %v2363_v49 = vrot.slane %v5840_v41, %v5407_v2 }
 0x53b   :  { %v5897_v29 = vpop.xlane.xlu1 %848  ;;  %v3443_v14 = vcombine.low %v2097_v37, %v2104_v31  ;;  %v3444_v40 = vcombine.low %v2111_v12, %v2118_v60  ;;  %v3408_v42 = vcombine.low %v3400_v32, %v3407_v11  ;;  %v2153_v58 = vrot.slane %v5867_v24, %v5401_v55 }
 0x53c   :  { %3960 = vperm.xlu1 %4561, %v3391_v27   ;;  %v2160_v56 = vrot.slane %v5867_v24, %v5404_v8  ;;  %v3417_v25 = vrot.slane %v3409_v36, %v5421_v23  ;;  %v3424_v53 = vrot.slane %v3410_v15, %v5421_v23  ;;  %v2167_v48 = vrot.slane %v5867_v24, %v5407_v2 }
 0x53d   :  { %3963 = vperm.xlu0 %4562, %v3408_v42   ;;  %v2174_v13 = vrot.slane %v5867_v24, %v5410_v6  ;;  %v3434_v26 = vrot.slane %v5815_v63, %v5421_v23  ;;  %v3441_v33 = vrot.slane %v5837_v43, %v5421_v23  ;;  %v2370_v20 = vrot.slane %v5840_v41, %v5410_v6  ;;  %v882_v43 = vpop.xlane.xlu0 %881 }
 0x53e   :  { %v2405_v30 = vrot.slane %v5871_v50, %v5401_v55  ;;  %v2412_v39 = vrot.slane %v5871_v50, %v5404_v8  ;;  %v3425_v35 = vcombine.low %v3417_v25, %v3424_v53  ;;  %v2419_v24 = vrot.slane %v5871_v50, %v5407_v2 }
 0x53f   :  { %v5920_v18 = vpop.xlane.xlu1 %854  ;;  %v2426_v63 = vrot.slane %v5871_v50, %v5410_v6  ;;  %v2461_v57 = vrot.slane %v876_v3, %v5401_v55  ;;  %v3442_v34 = vcombine.low %v3434_v26, %v3441_v33  ;;  %v2468_v41 = vrot.slane %v876_v3, %v5404_v8 }
 0x540   :  { %v2475_v62 = vrot.slane %v876_v3, %v5407_v2  ;;  %v2482_v38 = vrot.slane %v876_v3, %v5410_v6  ;;  %3966 = vperm.xlu1 %4561, %v3425_v35   ;;  %v3451_v9 = vrot.slane %v3443_v14, %v5421_v23  ;;  %v3477_v28 = vcombine.low %v2153_v58, %v2160_v56 }
 0x541   :  { %v3478_v37 = vcombine.low %v2167_v48, %v2174_v13  ;;  %3969 = vperm.xlu0 %4562, %v3442_v34   ;;  %v3458_v31 = vrot.slane %v3444_v40, %v5421_v23  ;;  %v3468_v50 = vrot.slane %v5851_v10, %v5421_v23  ;;  %v2307_v12 = vrot.slane %v5809_v1, %v5407_v2  ;;  %v888_v56 = vpop.xlane.xlu0 %887 }
 0x542   :  { %v2517_v60 = vrot.slane %v882_v43, %v5401_v55  ;;  %v2524_v21 = vrot.slane %v882_v43, %v5404_v8  ;;  %v3475_v36 = vrot.slane %v5853_v51, %v5421_v23  ;;  %v2314_v22 = vrot.slane %v5809_v1, %v5410_v6 }
 0x543   :  { %v861_v5 = vpop.xlane.xlu1 %860  ;;  %v5964_v32 = vcombine.low %v2293_v47, %v2300_v52  ;;  %v3596_v3 = vcombine.low %v2349_v7, %v2356_v17  ;;  %v3459_v11 = vcombine.low %v3451_v9, %v3458_v31  ;;  %v3597_v27 = vcombine.low %v2363_v49, %v2370_v20 }
 0x544   :  { %v3630_v10 = vcombine.low %v2405_v30, %v2412_v39  ;;  %v3631_v14 = vcombine.low %v2419_v24, %v2426_v63  ;;  %v3476_v40 = vcombine.low %v3468_v50, %v3475_v36  ;;  %v5966_v42 = vcombine.low %v2461_v57, %v2468_v41 }
 0x545   :  { %v3665_v58 = vcombine.low %v2475_v62, %v2482_v38  ;;  %3972 = vperm.xlu1 %4561, %v3459_v11   ;;  %v3485_v25 = vrot.slane %v3477_v28, %v5421_v23  ;;  %v3492_v51 = vrot.slane %v3478_v37, %v5421_v23  ;;  %v2531_v53 = vrot.slane %v882_v43, %v5407_v2 }
 0x546   :  { %v2538_v47 = vrot.slane %v882_v43, %v5410_v6  ;;  %v5972_v52 = vcombine.low %v2517_v60, %v2524_v21  ;;  %3975 = vperm.xlu0 %4562, %v3476_v40   ;;  %v2321_v7 = vrot.slane %v861_v5, %v5401_v55  ;;  %v2328_v48 = vrot.slane %v861_v5, %v5404_v8  ;;  %v6003_v40 = vpop.xlane.xlu0 %893 }
 0x547   :  { %v867_v15 = vpop.xlane.xlu1 %866  ;;  %v3493_v49 = vcombine.low %v3485_v25, %v3492_v51  ;;  %v2335_v13 = vrot.slane %v861_v5, %v5407_v2  ;;  %v2342_v26 = vrot.slane %v861_v5, %v5410_v6  ;;  %v2209_v33 = vrot.slane %v5897_v29, %v5401_v55 }
 0x548   :  { %v2573_v20 = vrot.slane %v888_v56, %v5401_v55  ;;  %v2580_v30 = vrot.slane %v888_v56, %v5404_v8  ;;  %v2587_v39 = vrot.slane %v888_v56, %v5407_v2  ;;  %v2594_v35 = vrot.slane %v888_v56, %v5410_v6 }
 0x549   :  { %3978 = vperm.xlu1 %4561, %v3493_v49   ;;  %v3604_v24 = vrot.slane %v3596_v3, %v5421_v23  ;;  %v3611_v63 = vrot.slane %v3597_v27, %v5421_v23  ;;  %v2377_v57 = vrot.slane %v867_v15, %v5401_v55  ;;  %v3699_v43 = vcombine.low %v2531_v53, %v2538_v47 }
 0x54a   :  { %v2216_v5 = vrot.slane %v5897_v29, %v5404_v8  ;;  %v2384_v34 = vrot.slane %v867_v15, %v5404_v8  ;;  %v2391_v41 = vrot.slane %v867_v15, %v5407_v2  ;;  %v3579_v38 = vcombine.low %v2321_v7, %v2328_v48 }
 0x54b   :  { %v873_v17 = vpop.xlane.xlu1 %872  ;;  %v3580_v9 = vcombine.low %v2335_v13, %v2342_v26  ;;  %v3612_v28 = vcombine.low %v3604_v24, %v3611_v63  ;;  %v2398_v37 = vrot.slane %v867_v15, %v5410_v6  ;;  %v2223_v31 = vrot.slane %v5897_v29, %v5407_v2 }
 0x54c   :  { %v2230_v50 = vrot.slane %v5897_v29, %v5410_v6  ;;  %v5996_v60 = vcombine.low %v2573_v20, %v2580_v30  ;;  %v3638_v21 = vrot.slane %v3630_v10, %v5421_v23  ;;  %v5999_v36 = vcombine.low %v2587_v39, %v2594_v35 }
 0x54d   :  { %3999 = vperm.xlu1 %4561, %v3612_v28   ;;  %v3613_v3 = vcombine.low %v2377_v57, %v2384_v34  ;;  %v3645_v11 = vrot.slane %v3631_v14, %v5421_v23  ;;  %v2433_v27 = vrot.slane %v873_v17, %v5401_v55  ;;  %v3614_v15 = vcombine.low %v2391_v41, %v2398_v37 }
 0x54e   :  { %v2440_v56 = vrot.slane %v873_v17, %v5404_v8  ;;  %v2447_v25 = vrot.slane %v873_v17, %v5407_v2  ;;  %v2454_v51 = vrot.slane %v873_v17, %v5410_v6  ;;  %v3587_v10 = vrot.slane %v3579_v38, %v5421_v23 }
 0x54f   :  { %v879_v62 = vpop.xlane.xlu1 %878  ;;  %v3646_v47 = vcombine.low %v3638_v21, %v3645_v11  ;;  %v3594_v7 = vrot.slane %v3580_v9, %v5421_v23  ;;  %v3672_v14 = vrot.slane %v5966_v42, %v5421_v23  ;;  %v3679_v13 = vrot.slane %v3665_v58, %v5421_v23  ;;  %v6023_v9 = vpop.xlane.xlu0 %899 }
 0x550   :  { %v3647_v49 = vcombine.low %v2433_v27, %v2440_v56  ;;  %v3648_v48 = vcombine.low %v2447_v25, %v2454_v51  ;;  %v2489_v26 = vrot.slane %v879_v62, %v5401_v55  ;;  %v2496_v30 = vrot.slane %v879_v62, %v5404_v8 }
 0x551   :  { %4005 = vperm.xlu1 %4561, %v3646_v47   ;;  %v3595_v20 = vcombine.low %v3587_v10, %v3594_v7  ;;  %v2503_v17 = vrot.slane %v879_v62, %v5407_v2  ;;  %v2510_v39 = vrot.slane %v879_v62, %v5410_v6  ;;  %v3680_v35 = vcombine.low %v3672_v14, %v3679_v13 }
 0x552   :  { %v3621_v24 = vrot.slane %v3613_v3, %v5421_v23  ;;  %v3628_v63 = vrot.slane %v3614_v15, %v5421_v23  ;;  %v3706_v42 = vrot.slane %v5972_v52, %v5421_v23  ;;  %v3681_v58 = vcombine.low %v2489_v26, %v2496_v30 }
 0x553   :  { %v885_v53 = vpop.xlane.xlu1 %884  ;;  %3996 = vperm.xlu0 %4562, %v3595_v20   ;;  %v3682_v34 = vcombine.low %v2503_v17, %v2510_v39  ;;  %v3713_v41 = vrot.slane %v3699_v43, %v5421_v23  ;;  %v3655_v52 = vrot.slane %v3647_v49, %v5421_v23  ;;  %v3662_v11 = vrot.slane %v3648_v48, %v5421_v23  ;;  %v6062_v30 = vpop.xlane.xlu0 %905 }
 0x554   :  { %v2545_v38 = vrot.slane %v885_v53, %v5401_v55  ;;  %v3629_v28 = vcombine.low %v3621_v24, %v3628_v63  ;;  %v2552_v62 = vrot.slane %v885_v53, %v5404_v8  ;;  %v2559_v37 = vrot.slane %v885_v53, %v5407_v2 }
 0x555   :  { %v2566_v21 = vrot.slane %v885_v53, %v5410_v6  ;;  %4011 = vperm.xlu1 %4561, %v3680_v35   ;;  %v3714_v3 = vcombine.low %v3706_v42, %v3713_v41  ;;  %v3740_v43 = vrot.slane %v5996_v60, %v5421_v23  ;;  %v3747_v56 = vrot.slane %v5999_v36, %v5421_v23 }
 0x556   :  { %v3715_v27 = vcombine.low %v2545_v38, %v2552_v62  ;;  %v3663_v53 = vcombine.low %v3655_v52, %v3662_v11  ;;  %v2265_v60 = vrot.slane %v5920_v18, %v5401_v55  ;;  %v2272_v14 = vrot.slane %v5920_v18, %v5404_v8 }
 0x557   :  { %v891_v57 = vpop.xlane.xlu1 %890  ;;  %v3716_v15 = vcombine.low %v2559_v37, %v2566_v21  ;;  %4002 = vperm.xlu0 %4562, %v3629_v28   ;;  %v3689_v36 = vrot.slane %v3681_v58, %v5421_v23  ;;  %v3696_v49 = vrot.slane %v3682_v34, %v5421_v23  ;;  %v3511_v48 = vcombine.low %v2209_v33, %v2216_v5 }
 0x558   :  { %v2601_v25 = vrot.slane %v891_v57, %v5401_v55  ;;  %v2608_v47 = vrot.slane %v891_v57, %v5404_v8  ;;  %v2615_v10 = vrot.slane %v891_v57, %v5407_v2  ;;  %v2622_v7 = vrot.slane %v891_v57, %v5410_v6 }
 0x559   :  { %v3512_v13 = vcombine.low %v2223_v31, %v2230_v50  ;;  %v2279_v26 = vrot.slane %v5920_v18, %v5407_v2  ;;  %v2286_v20 = vrot.slane %v5920_v18, %v5410_v6  ;;  %4017 = vperm.xlu1 %4561, %v3714_v3   ;;  %v3748_v17 = vcombine.low %v3740_v43, %v3747_v56 }
 0x55a   :  { %v3749_v39 = vcombine.low %v2601_v25, %v2608_v47  ;;  %v3502_v33 = vrot.slane %v5892_v46, %v5421_v23  ;;  %v3509_v5 = vrot.slane %v5894_v16, %v5421_v23  ;;  %v3750_v29 = vcombine.low %v2615_v10, %v2622_v7 }
 0x55b   :  { %v6035_v51 = vpop.xlane.xlu1 %896  ;;  %4008 = vperm.xlu0 %4562, %v3663_v53   ;;  %v3697_v31 = vcombine.low %v3689_v36, %v3696_v49  ;;  %v3723_v50 = vrot.slane %v3715_v27, %v5421_v23  ;;  %v3730_v18 = vrot.slane %v3716_v15, %v5421_v23  ;;  %v6078_v46 = vcombine.low %v2307_v12, %v2314_v22 }
 0x55c   :  { %v6080_v24 = vcombine.low %v2265_v60, %v2272_v14  ;;  %v2629_v16 = vrot.slane %v6003_v40, %v5401_v55  ;;  %v2636_v63 = vrot.slane %v6003_v40, %v5404_v8  ;;  %v6086_v42 = vcombine.low %v2279_v26, %v2286_v20 }
 0x55d   :  { %v2643_v57 = vrot.slane %v6003_v40, %v5407_v2  ;;  %v2650_v58 = vrot.slane %v6003_v40, %v5410_v6  ;;  %v2685_v1 = vrot.slane %v6023_v9, %v5401_v55  ;;  %4023 = vperm.xlu1 %4561, %v3748_v17   ;;  %v2692_v12 = vrot.slane %v6023_v9, %v5404_v8 }
 0x55e   :  { %v3510_v22 = vcombine.low %v3502_v33, %v3509_v5  ;;  %v3519_v34 = vrot.slane %v3511_v48, %v5421_v23  ;;  %v6099_v41 = vsub.s32 %v5637_v0, %v5150_v19  ;;  %v3731_v28 = vcombine.low %v3723_v50, %v3730_v18 }
 0x55f   :  { %v6068_v35 = vpop.xlane.xlu1 %902  ;;  %4014 = vperm.xlu0 %4562, %v3697_v31   ;;  %v3526_v62 = vrot.slane %v3512_v13, %v5421_v23  ;;  %v3757_v40 = vrot.slane %v3749_v39, %v5421_v23  ;;  %v3764_v37 = vrot.slane %v3750_v29, %v5421_v23  ;;  %v2657_v3 = vrot.slane %v6035_v51, %v5401_v55 }
 0x560   :  { %v3856_v38 = vpop.permute.xlu0 %3855  ;;  %v2664_v52 = vrot.slane %v6035_v51, %v5404_v8  ;;  %v3766_v43 = vcombine.low %v2629_v16, %v2636_v63  ;;  %v3767_v27 = vcombine.low %v2643_v57, %v2650_v58  ;;  %v2671_v15 = vrot.slane %v6035_v51, %v5407_v2 }
 0x561   :  { %v4051_v0 = vrot.slane %v3856_v38, %v6099_v41  ;;  %3981 = vperm.xlu1 %4561, %v3510_v22   ;;  %v2678_v56 = vrot.slane %v6035_v51, %v5410_v6  ;;  %v2699_v25 = vrot.slane %v6023_v9, %v5407_v2  ;;  %v2706_v53 = vrot.slane %v6023_v9, %v5410_v6 }
 0x562   :  { %v6121_v10 = vsub.s32 %v5663_v45, %v5150_v19  ;;  %v3527_v7 = vcombine.low %v3519_v34, %v3526_v62  ;;  %v3765_v60 = vcombine.low %v3757_v40, %v3764_v37  ;;  %v3536_v14 = vrot.slane %v5906_v59, %v5421_v23 }
 0x563   :  { %v3853_v21 = vpop.permute.xlu1 %3852  ;;  %4020 = vperm.xlu0 %4562, %v3731_v28   ;;  %v3543_v51 = vrot.slane %v5908_v44, %v5421_v23  ;;  %v3800_v49 = vcombine.low %v2685_v1, %v2692_v12  ;;  %v3783_v48 = vcombine.low %v2657_v3, %v2664_v52  ;;  %v6130_v13 = vsub.s32 %v5876_v54, %v5150_v19 }
 0x564   :  { %v4046_v11 = vrot.slane %v3853_v21, %v5161_v4  ;;  %v3784_v45 = vcombine.low %v2671_v15, %v2678_v56  ;;  %v3774_v26 = vrot.slane %v3766_v43, %v5421_v23  ;;  %v3781_v20 = vrot.slane %v3767_v27, %v5421_v23 }
 0x565   :  { %3984 = vperm.xlu1 %4561, %v3527_v7   ;;  %v4068_v59 = vadd.s32 4294967264, %v6418_v61  ;;  %v3801_v17 = vcombine.low %v2699_v25, %v2706_v53  ;;  %v2741_v44 = vrot.slane %v6062_v30, %v5401_v55  ;;  %v2713_v39 = vrot.slane %v6068_v35, %v5401_v55 }
 0x566   :  { %v4053_v47 = vsel %vm4052_vm3, %v4051_v0, %v4046_v11  ;;  %v3544_v54 = vcombine.low %v3536_v14, %v3543_v51  ;;  %v3553_v5 = vrot.slane %v6080_v24, %v5421_v23  ;;  %v3560_v29 = vrot.slane %v6086_v42, %v5421_v23 }
 0x567   :  { %v3859_v36 = vpop.permute.xlu1 %3858  ;;  %4026 = vperm.xlu0 %4562, %v3765_v60   ;;  %v4075_v50 = vadd.s32 4294967256, %v6418_v61  ;;  %v2720_v18 = vrot.slane %v6068_v35, %v5404_v8  ;;  %v2727_v16 = vrot.slane %v6068_v35, %v5407_v2  ;;  %v6151_v63 = vsub.s32 %v4068_v59, %v5150_v19 }
 0x568   :  { %v4058_v9 = vrot.slane %v3859_v36, %v6121_v10  ;;  %v2734_v24 = vrot.slane %v6068_v35, %v5410_v6  ;;  %v3782_v57 = vcombine.low %v3774_v26, %v3781_v20  ;;  %v3791_v42 = vrot.slane %v3783_v48, %v5421_v23 }
 0x569   :  { %3987 = vperm.xlu1 %4561, %v3544_v54   ;;  %v3798_v58 = vrot.slane %v3784_v45, %v5421_v23  ;;  %v2748_v1 = vrot.slane %v6062_v30, %v5404_v8  ;;  %v3570_v12 = vrot.slane %v5964_v32, %v5421_v23  ;;  %v3577_v22 = vrot.slane %v6078_v46, %v5421_v23 }
 0x56a   :  { %v4060_v33 = vsel %vm4059_vm4, %v4058_v9, %v4053_v47  ;;  %v3561_v38 = vcombine.low %v3553_v5, %v3560_v29  ;;  %v6165_v28 = vsub.s32 %v4075_v50, %v5150_v19  ;;  %v4082_v62 = vadd.s32 4294967248, %v6418_v61 }
 0x56b   :  { %v3862_v31 = vpop.permute.xlu1 %3861  ;;  %4029 = vperm.xlu0 %4562, %v3782_v57   ;;  %v2755_v8 = vrot.slane %v6062_v30, %v5407_v2  ;;  %v2762_v32 = vrot.slane %v6062_v30, %v5410_v6  ;;  %v3817_v40 = vcombine.low %v2713_v39, %v2720_v18  ;;  %v3818_v37 = vcombine.low %v2727_v16, %v2734_v24 }
 0x56c   :  { %v4065_v55 = vrot.slane %v3862_v31, %v6130_v13  ;;  %v3799_v21 = vcombine.low %v3791_v42, %v3798_v58  ;;  %v3808_v3 = vrot.slane %v3800_v49, %v5421_v23  ;;  %v3815_v52 = vrot.slane %v3801_v17, %v5421_v23 }
 0x56d   :  { %3990 = vperm.xlu1 %4561, %v3561_v38   ;;  %v3578_v43 = vcombine.low %v3570_v12, %v3577_v22  ;;  %v6178_v6 = vsub.s32 %v4082_v62, %v5150_v19  ;;  %v4089_v30 = vadd.s32 4294967240, %v6418_v61  ;;  %v3834_v27 = vcombine.low %v2741_v44, %v2748_v1 }
 0x56e   :  { %v4067_v34 = vsel %vm4066_vm5, %v4065_v55, %v4060_v33  ;;  %v3835_v15 = vcombine.low %v2755_v8, %v2762_v32  ;;  %v3816_v56 = vcombine.low %v3808_v3, %v3815_v52  ;;  %v3825_v53 = vrot.slane %v3817_v40, %v5421_v23 }
 0x56f   :  { %v3865_v35 = vpop.permute.xlu1 %3864  ;;  %4032 = vperm.xlu0 %4562, %v3799_v21   ;;  %v3832_v47 = vrot.slane %v3818_v37, %v5421_v23  ;;  %v4096_v60 = vadd.s32 4294967232, %v6418_v61  ;;  %v6187_v51 = vsub.s32 %v4089_v30, %v5150_v19  ;;  %v4103_v36 = vadd.s32 4294967224, %v6418_v61 }
 0x570   :  { %v4072_v46 = vrot.slane %v3865_v35, %v6151_v63  ;;  %v3868_v11 = vpop.permute.xlu0 %3867  ;;  %v3842_v9 = vrot.slane %v3834_v27, %v5421_v23  ;;  %v3849_v45 = vrot.slane %v3835_v15, %v5421_v23  ;;  %v4110_v44 = vadd.s32 4294967216, %v6418_v61 }
 0x571   :  { %v4079_v2 = vrot.slane %v3868_v11, %v6165_v28  ;;  %3993 = vperm.xlu1 %4561, %v3578_v43   ;;  %v3833_v49 = vcombine.low %v3825_v53, %v3832_v47  ;;  %v6194_v20 = vsub.s32 %v4096_v60, %v5150_v19  ;;  %v6198_v17 = vsub.s32 %v4103_v36, %v5150_v19 }
 0x572   :  { %v4074_v0 = vsel %vm4073_vm6, %v4072_v46, %v4067_v34  ;;  %v4117_v39 = vadd.s32 4294967208, %v6418_v61  ;;  %v3850_v33 = vcombine.low %v3842_v9, %v3849_v45  ;;  %v4124_v29 = vadd.s32 4294967200, %v6418_v61 }
 0x573   :  { %v4081_v25 = vsel %vm4080_vm7, %v4079_v2, %v4074_v0  ;;  %4035 = vperm.xlu0 %4562, %v3816_v56   ;;  %v4131_v31 = vadd.s32 4294967192, %v6418_v61  ;;  %v6208_v16 = vsub.s32 %v4110_v44, %v5150_v19  ;;  %v4138_v38 = vadd.s32 4294967184, %v6418_v61 }
 0x574   :  { %v3871_v7 = vpop.permute.xlu1 %3870  ;;  %v6211_v55 = vsub.s32 %v4117_v39, %v5150_v19  ;;  %v6216_v1 = vsub.s32 %v4124_v29, %v5150_v19  ;;  %v4145_v35 = vadd.s32 4294967176, %v6418_v61 }
 0x575   :  { %v4086_v14 = vrot.slane %v3871_v7, %v6178_v6  ;;  %v6219_v12 = vsub.s32 %v4131_v31, %v5150_v19  ;;  %v6230_v21 = vsub.s32 %v4138_v38, %v5150_v19 }
 0x576   :  { %v6233_v3 = vsub.s32 %v4145_v35, %v5150_v19 }
 0x577   :  { %v4088_v48 = vsel %vm4087_vm8, %v4086_v14, %v4081_v25  ;;  %4038 = vperm.xlu0 %4562, %v3833_v49  }
 0x578   :  { %v3874_v26 = vpop.permute.xlu0 %3873 }
 0x579   :  { %v4093_v59 = vrot.slane %v3874_v26, %v6187_v51 }
 0x57b   :  { %v4095_v54 = vsel %vm4094_vm9, %v4093_v59, %v4088_v48  ;;  %4041 = vperm.xlu0 %4562, %v3850_v33  }
 0x57c   :  { %v3877_v23 = vpop.permute.xlu1 %3876  ;;  %v3880_v5 = vpop.permute.xlu0 %3879 }
 0x57d   :  { %v4100_v50 = vrot.slane %v3877_v23, %v6194_v20  ;;  %v4107_v18 = vrot.slane %v3880_v5, %v6198_v17 }
 0x57f   :  { %v4102_v24 = vsel %vm4101_vm10, %v4100_v50, %v4095_v54 }
 0x580   :  { %v4109_v57 = vsel %vm4108_vm11, %v4107_v18, %v4102_v24  ;;  %v3883_v42 = vpop.permute.xlu1 %3882  ;;  %v3886_v58 = vpop.permute.xlu0 %3885 }
 0x581   :  { %v4114_v22 = vrot.slane %v3883_v42, %v6208_v16  ;;  %v4121_v34 = vrot.slane %v3886_v58, %v6211_v55 }
 0x583   :  { %v4116_v62 = vsel %vm4115_vm12, %v4114_v22, %v4109_v57 }
 0x584   :  { %v4123_v8 = vsel %vm4122_vm13, %v4121_v34, %v4116_v62  ;;  %v3889_v32 = vpop.permute.xlu1 %3888  ;;  %v3892_v40 = vpop.permute.xlu0 %3891 }
 0x585   :  { %v4128_v46 = vrot.slane %v3889_v32, %v6216_v1  ;;  %v4135_v37 = vrot.slane %v3892_v40, %v6219_v12 }
 0x587   :  { %v4130_v61 = vsel %vm4129_vm14, %v4128_v46, %v4123_v8 }
 0x588   :  { %v4137_v52 = vsel %vm4136_vm15, %v4135_v37, %v4130_v61  ;;  %v3895_v0 = vpop.permute.xlu1 %3894  ;;  %v3898_v11 = vpop.permute.xlu0 %3897 }
 0x589   :  { %v4142_v43 = vrot.slane %v3895_v0, %v6230_v21  ;;  %v4149_v2 = vrot.slane %v3898_v11, %v6233_v3 }
 0x58b   :  { %v4144_v30 = vsel %vm4143_vm1, %v4142_v43, %v4137_v52 }
 0x58c   :  { %v6241_v27 = vsel %vm4150_vm2, %v4149_v2, %v4144_v30  ;;  %v3901_v15 = vpop.permute.xlu1 %3900  ;;  %v3904_v19 = vpop.permute.xlu0 %3903 }
 0x58d   :  { %v4155_v56 = vrot.slane %v3901_v15, %v5161_v4  ;;  %v4159_v25 = vrot.slane %v3904_v19, %v6099_v41 }
 0x58f   :  { %v4160_v53 = vsel %vm4052_vm3, %v4159_v25, %v4155_v56 }
 0x590   :  { %v3907_v47 = vpop.permute.xlu1 %3906  ;;  %v3910_v14 = vpop.permute.xlu0 %3909 }
 0x591   :  { %v4164_v7 = vrot.slane %v3907_v47, %v6121_v10  ;;  %v4169_v36 = vrot.slane %v3910_v14, %v6130_v13 }
 0x593   :  { %v4165_v60 = vsel %vm4059_vm4, %v4164_v7, %v4160_v53 }
 0x594   :  { %v4170_v49 = vsel %vm4066_vm5, %v4169_v36, %v4165_v60  ;;  %v3913_v48 = vpop.permute.xlu1 %3912 }
 0x595   :  { %v4174_v9 = vrot.slane %v3913_v48, %v6151_v63 }
 0x597   :  { %v4175_v45 = vsel %vm4073_vm6, %v4174_v9, %v4170_v49 }
 0x598   :  { %v3916_v26 = vpop.permute.xlu0 %3915 }
 0x599   :  { %v4179_v59 = vrot.slane %v3916_v26, %v6165_v28 }
 0x59a   :  { %v3919_v39 = vpop.permute.xlu1 %3918 }
 0x59b   :  { %v4180_v44 = vsel %vm4080_vm7, %v4179_v59, %v4175_v45  ;;  %v4184_v33 = vrot.slane %v3919_v39, %v6178_v6 }
 0x59c   :  { %v3922_v54 = vpop.permute.xlu0 %3921 }
 0x59d   :  { %v4185_v23 = vsel %vm4087_vm8, %v4184_v33, %v4180_v44  ;;  %v4189_v5 = vrot.slane %v3922_v54, %v6187_v51 }
 0x59f   :  { %v4190_v29 = vsel %vm4094_vm9, %v4189_v5, %v4185_v23  ;;  %v3925_v31 = vpop.permute.xlu1 %3924 }
 0x5a0   :  { %v4194_v50 = vrot.slane %v3925_v31, %v6194_v20 }
 0x5a1   :  { %v3928_v18 = vpop.permute.xlu0 %3927 }
 0x5a2   :  { %v4195_v24 = vsel %vm4101_vm10, %v4194_v50, %v4190_v29  ;;  %v4199_v57 = vrot.slane %v3928_v18, %v6198_v17 }
 0x5a4   :  { %v4200_v42 = vsel %vm4108_vm11, %v4199_v57, %v4195_v24  ;;  %v3931_v58 = vpop.permute.xlu1 %3930 }
 0x5a5   :  { %v4204_v22 = vrot.slane %v3931_v58, %v6208_v16 }
 0x5a6   :  { %v3934_v34 = vpop.permute.xlu0 %3933 }
 0x5a7   :  { %v4205_v38 = vsel %vm4115_vm12, %v4204_v22, %v4200_v42  ;;  %v4209_v35 = vrot.slane %v3934_v34, %v6211_v55 }
 0x5a9   :  { %v4210_v62 = vsel %vm4122_vm13, %v4209_v35, %v4205_v38  ;;  %v3937_v8 = vpop.permute.xlu1 %3936 }
 0x5aa   :  { %v4214_v32 = vrot.slane %v3937_v8, %v6216_v1  ;;  %v3940_v40 = vpop.permute.xlu0 %3939 }
 0x5ab   :  { %v4219_v46 = vrot.slane %v3940_v40, %v6219_v12 }
 0x5ac   :  { %v4215_v37 = vsel %vm4129_vm14, %v4214_v32, %v4210_v62 }
 0x5ad   :  { %v4220_v61 = vsel %vm4136_vm15, %v4219_v46, %v4215_v37  ;;  %v3943_v52 = vpop.permute.xlu1 %3942 }
 0x5ae   :  { %v4224_v0 = vrot.slane %v3943_v52, %v6230_v21  ;;  %v3946_v11 = vpop.permute.xlu0 %3945 }
 0x5af   :  { %v4229_v43 = vrot.slane %v3946_v11, %v6233_v3 }
 0x5b0   :  { %v4225_v2 = vsel %vm4143_vm1, %v4224_v0, %v4220_v61 }
 0x5b1   :  { %v6274_v30 = vsel %vm4150_vm2, %v4229_v43, %v4225_v2 }
 0x5b2   :  { %v3949_v15 = vpop.permute.xlu1 %3948  ;;  %v3952_v19 = vpop.permute.xlu0 %3951 }
 0x5b3   :  { %v4234_v5 = vrot.slane %v3949_v15, %v5161_v4  ;;  %v4238_v29 = vrot.slane %v3952_v19, %v6099_v41 }
 0x5b5   :  { %v4239_v42 = vsel %vm4052_vm3, %v4238_v29, %v4234_v5 }
 0x5b6   :  { %v3955_v56 = vpop.permute.xlu1 %3954 }
 0x5b7   :  { %v3958_v53 = vpop.permute.xlu0 %3957  ;;  %v4243_v31 = vrot.slane %v3955_v56, %v6121_v10 }
 0x5b8   :  { %v4248_v58 = vrot.slane %v3958_v53, %v6130_v13 }
 0x5b9   :  { %v4244_v34 = vsel %vm4059_vm4, %v4243_v31, %v4239_v42 }
 0x5bb   :  { %v3961_v25 = vpop.permute.xlu1 %3960 }
 0x5bc   :  { %v3964_v7 = vpop.permute.xlu0 %3963  ;;  %v4253_v38 = vrot.slane %v3961_v25, %v6151_v63 }
 0x5bd   :  { %v4258_v40 = vrot.slane %v3964_v7, %v6165_v28 }
 0x5bf   :  { %v3967_v47 = vpop.permute.xlu1 %3966 }
 0x5c0   :  { %v3970_v14 = vpop.permute.xlu0 %3969  ;;  %v4263_v37 = vrot.slane %v3967_v47, %v6178_v6 }
 0x5c1   :  { %v4268_v43 = vrot.slane %v3970_v14, %v6187_v51 }
 0x5c4   :  { %v3973_v60 = vpop.permute.xlu1 %3972 }
 0x5c5   :  { %v3976_v48 = vpop.permute.xlu0 %3975 }
 0x5c6   :  { %v4278_v7 = vrot.slane %v3976_v48, %v6198_v17 }
 0x5c8   :  { %v6276_v36 = vpop.permute.xlu1 %3978 }
 0x5cc   :  { %v4000_v49 = vpop.permute.xlu1 %3999 }
 0x5cd   :  { %v4317_v22 = vrot.slane %v4000_v49, %v6099_v41  ;;  %v4283_v49 = vrot.slane %v6276_v36, %v6208_v16 }
 0x5d0   :  { %v4006_v9 = vpop.permute.xlu1 %4005 }
 0x5d1   :  { %v4327_v46 = vrot.slane %v4006_v9, %v6130_v13  ;;  %v4273_v13 = vrot.slane %v3973_v60, %v6194_v20 }
 0x5d2   :  { %v3997_v45 = vpop.permute.xlu0 %3996 }
 0x5d3   :  { %v4313_v18 = vrot.slane %v3997_v45, %v5161_v4 }
 0x5d4   :  { %v4012_v26 = vpop.permute.xlu1 %4011 }
 0x5d5   :  { %v4318_v62 = vsel %vm4052_vm3, %v4317_v22, %v4313_v18  ;;  %v4337_v2 = vrot.slane %v4012_v26, %v6165_v28 }
 0x5d6   :  { %v4003_v59 = vpop.permute.xlu0 %4002 }
 0x5d7   :  { %v4322_v24 = vrot.slane %v4003_v59, %v6121_v10  ;;  %v4249_v10 = vsel %vm4066_vm5, %v4248_v58, %v4244_v34 }
 0x5d8   :  { %v4018_v44 = vpop.permute.xlu1 %4017  ;;  %v4254_v41 = vsel %vm4073_vm6, %v4253_v38, %v4249_v10 }
 0x5d9   :  { %v4323_v8 = vsel %vm4059_vm4, %v4322_v24, %v4318_v62  ;;  %v4347_v14 = vrot.slane %v4018_v44, %v6187_v51 }
 0x5da   :  { %v4009_v39 = vpop.permute.xlu0 %4008  ;;  %v4328_v52 = vsel %vm4066_vm5, %v4327_v46, %v4323_v8 }
 0x5db   :  { %v4332_v4 = vrot.slane %v4009_v39, %v6151_v63  ;;  %v4259_v63 = vsel %vm4080_vm7, %v4258_v40, %v4254_v41 }
 0x5dc   :  { %v4024_v33 = vpop.permute.xlu1 %4023  ;;  %v4264_v15 = vsel %vm4087_vm8, %v4263_v37, %v4259_v63 }
 0x5dd   :  { %v4333_v0 = vsel %vm4073_vm6, %v4332_v4, %v4328_v52  ;;  %v4357_v51 = vrot.slane %v4024_v33, %v6198_v17 }
 0x5de   :  { %v4015_v54 = vpop.permute.xlu0 %4014  ;;  %v4338_v25 = vsel %vm4080_vm7, %v4337_v2, %v4333_v0 }
 0x5df   :  { %v4342_v11 = vrot.slane %v4015_v54, %v6178_v6  ;;  %v4269_v6 = vsel %vm4094_vm9, %v4268_v43, %v4264_v15 }
 0x5e0   :  { %v3982_v23 = vpop.permute.xlu1 %3981  ;;  %v4274_v28 = vsel %vm4101_vm10, %v4273_v13, %v4269_v6 }
 0x5e1   :  { %v4343_v53 = vsel %vm4087_vm8, %v4342_v11, %v4338_v25  ;;  %v4288_v9 = vrot.slane %v3982_v23, %v6211_v55  ;;  %v4279_v48 = vsel %vm4108_vm11, %v4278_v7, %v4274_v28 }
 0x5e2   :  { %v4021_v50 = vpop.permute.xlu0 %4020  ;;  %v4348_v45 = vsel %vm4094_vm9, %v4347_v14, %v4343_v53  ;;  %v4284_v54 = vsel %vm4115_vm12, %v4283_v49, %v4279_v48 }
 0x5e3   :  { %v4352_v47 = vrot.slane %v4021_v50, %v6194_v20  ;;  %v4289_v31 = vsel %vm4122_vm13, %v4288_v9, %v4284_v54 }
 0x5e4   :  { %v3985_v57 = vpop.permute.xlu1 %3984 }
 0x5e5   :  { %v4293_v26 = vrot.slane %v3985_v57, %v6216_v1  ;;  %v4353_v20 = vsel %vm4101_vm10, %v4352_v47, %v4348_v45 }
 0x5e6   :  { %v4027_v35 = vpop.permute.xlu0 %4026 }
 0x5e7   :  { %v4362_v59 = vrot.slane %v4027_v35, %v6208_v16  ;;  %v4358_v16 = vsel %vm4108_vm11, %v4357_v51, %v4353_v20  ;;  %v4294_v17 = vsel %vm4129_vm14, %v4293_v26, %v4289_v31 }
 0x5e8   :  { %v3988_v32 = vpop.permute.xlu1 %3987 }
 0x5e9   :  { %v4298_v44 = vrot.slane %v3988_v32, %v6219_v12  ;;  %v4363_v33 = vsel %vm4115_vm12, %v4362_v59, %v4358_v16 }
 0x5ea   :  { %v4030_v61 = vpop.permute.xlu0 %4029 }
 0x5eb   :  { %v4367_v36 = vrot.slane %v4030_v61, %v6211_v55  ;;  %v4299_v24 = vsel %vm4136_vm15, %v4298_v44, %v4294_v17 }
 0x5ec   :  { %v3991_v19 = vpop.permute.xlu1 %3990 }
 0x5ed   :  { %v4303_v23 = vrot.slane %v3991_v19, %v6230_v21  ;;  %v4368_v57 = vsel %vm4122_vm13, %v4367_v36, %v4363_v33 }
 0x5ee   :  { %v4033_v56 = vpop.permute.xlu0 %4032 }
 0x5ef   :  { %v4372_v5 = vrot.slane %v4033_v56, %v6216_v1  ;;  %v4304_v1 = vsel %vm4143_vm1, %v4303_v23, %v4299_v24 }
 0x5f0   :  { %v3994_v39 = vpop.permute.xlu1 %3993 }
 0x5f1   :  { %v4308_v50 = vrot.slane %v3994_v39, %v6233_v3  ;;  %v4373_v42 = vsel %vm4129_vm14, %v4372_v5, %v4368_v57 }
 0x5f2   :  { %v4036_v60 = vpop.permute.xlu0 %4035 }
 0x5f3   :  { %v4377_v18 = vrot.slane %v4036_v60, %v6219_v12  ;;  %v4309_v22 = vsel %vm4150_vm2, %v4308_v50, %v4304_v1 }
 0x5f4   :  { %v4389_v35 = vsel %vm491_vm0, %v4309_v22, %v6241_v27 }
 0x5f5   :  { %v4378_v34 = vsel %vm4136_vm15, %v4377_v18, %v4373_v42 }
 0x5f6   :  { %v4039_v29 = vpop.permute.xlu0 %4038 }
 0x5f7   :  { %v4382_v55 = vrot.slane %v4039_v29, %v6230_v21 }
 0x5f9   :  { %v4383_v38 = vsel %vm4143_vm1, %v4382_v55, %v4378_v34 }
 0x5fa   :  { %v4042_v58 = vpop.permute.xlu0 %4041 }
 0x5fb   :  { %v4387_v12 = vrot.slane %v4042_v58, %v6233_v3 }
 0x5fd   :  { %v4388_v21 = vsel %vm4150_vm2, %v4387_v12, %v4383_v38 }
 0x5fe   :  { %v4390_v62 = vsel %vm491_vm0, %v4388_v21, %v6274_v30 }
 0x5ff   :  { %v4391_v8 = vcombine.low %v4389_v35, %v4390_v62 }
 0x601   :  { %4479 = vst.sshfl [vmem:[#allocation3] sm:$0x33 pattern:$0x76325410] %v4391_v8 }
 0x602   :  { %4636 = shalt.err (!%p4633_p4)
}
 0x603   :  { %s4637_s23 = scalar_lea.hbm %s6360_s3, 64 }
 0x604   :  { %p4638_p5 = scmp.ne.s32.totalorder %s6360_s3, %s4637_s23  ;;  %p4641_p6 = scmp.lt.u32.totalorder %s4637_s23, %s6360_s3 }
 0x606   :  { %p4643_p7 = pnand %p4641_p6, %p4638_p5 }
 0x608   :  { %4646 = shalt.err (!%p4643_p7)
}
 0x609   :  { %4410 = dma.vmem_to_hbm [thread:$0]  %s4408_s19, 64, %s6360_s3, [#allocation4]  }
 0x60a   :  { %4647 = dma.done.wait [#allocation4], 64  }
 0x60b   :  { %4648 = vsyncadd [#allocation4], 4294967232 }
 0x60c   :  { %4414 = vsyncpa [#allocation4], 1 }

</bundles_post_ra>
